<compile_context>
chip_gen: v5e
topology: v5e:2x2
jax: 0.10.0
libtpu: 0.0.40
codegen_flags: <defaults>
</compile_context>

<pallas_src>
import functools

import jax
import jax.numpy as jnp
from jax.experimental import pallas as pl
from jax.experimental.pallas import tpu as pltpu

_HIDDEN = 128
_OUT_PAD = 8    # out_dim (3) padded to one f32 sublane tile (output rows)
_K_PAD = 16     # in_dim (7) padded so K is tile-aligned for both f32 and bf16


def _round_up(n, m):
    return ((n + m - 1) // m) * m


def _mlp_kernel(x_ref, w1_ref, w2_ref, w3t_ref, b1_ref, b2_ref, b3_ref, o_ref,
                *, precision):
    """Fused MLP for one batch tile.

    x_ref  : (TB, 16)   compute dtype (bf16 default); cols 7..15 are zero
    w1_ref : (16, 128)  rows 7..15 zero
    w2_ref : (128, 128)
    w3t_ref: (8, 128)   w3^T, rows 3..7 zero
    b1/b2  : (1, 128)   f32 bias rows
    b3_ref : (8, 1)     f32 bias column, rows 3..7 zero
    o_ref  : (8, TB)    f32 TRANSPOSED output (lane dim = batch, lane-dense)
    """
    f32 = jnp.float32
    cdt = w1_ref.dtype

    x = x_ref[...]                                            # already cdt
    h1 = jnp.dot(x, w1_ref[...], preferred_element_type=f32,
                 precision=precision) + b1_ref[...]
    h1 = jnp.maximum(h1, 0.0)

    h2 = jnp.dot(h1.astype(cdt), w2_ref[...], preferred_element_type=f32,
                 precision=precision) + b2_ref[...]
    h2 = jnp.maximum(h2, 0.0)

    # Transposed last layer: out^T (8, TB) = w3^T @ h2^T.  The (TB,128)
    # transpose goes to the XLU and hides under the MXU/DMA; the store is a
    # lane-dense (8, TB) f32 slab (16x fewer bytes than a padded (TB,128)).
    out_t = jnp.dot(w3t_ref[...], h2.astype(cdt).T,
                    preferred_element_type=f32, precision=precision)
    o_ref[...] = (out_t + b3_ref[...]).astype(o_ref.dtype)


def prepare_params(params, weights_dtype=jnp.bfloat16):
    """Pad / transpose / cast parameters once (hoisted out of the forward path).

    Params are stored transposed vs. PyTorch, i.e. w has shape (in, out), so
    y = x @ w + b matches nn.Linear.  bf16 is recommended on all generations
    (v5e becomes MXU-bound once the memory fixes land; f32 matmuls there would
    directly cost wall time)."""
    w1 = params["w1"]                       # (7, 128)
    w2 = params["w2"]                       # (128, 128)
    w3 = params["w3"]                       # (128, 3)
    in_dim, hidden = w1.shape
    out_dim = w3.shape[1]

    w1p = jnp.zeros((_K_PAD, hidden), jnp.float32).at[:in_dim, :].set(w1)
    w3t = jnp.zeros((_OUT_PAD, hidden), jnp.float32).at[:out_dim, :].set(w3.T)
    b3c = jnp.zeros((_OUT_PAD, 1), jnp.float32).at[:out_dim, 0].set(params["b3"][0])

    return {
        "w1": w1p.astype(weights_dtype),
        "w2": w2.astype(weights_dtype),
        "w3t": w3t.astype(weights_dtype),
        "b1": params["b1"].astype(jnp.float32),   # (1, 128)
        "b2": params["b2"].astype(jnp.float32),   # (1, 128)
        "b3c": b3c,                               # (8, 1)
    }


def direct_net_forward(x, prepped, *, block_b=512, out_dim=3):
    """x: [B, 7] float32.  prepped: output of prepare_params()."""
    B, in_dim = x.shape
    w1 = prepped["w1"]
    k_pad, hidden = w1.shape
    cdt = w1.dtype

    # Batch tile: lane-dense multiple of 128 (batch is the lane dim of the
    # transposed output), capped at block_b.  On v7x feel free to pass
    # block_b=2048: double-buffered VMEM is still only a few MiB.
    TB = _round_up(min(block_b, _round_up(B, 128)), 128)
    B_pad = _round_up(B, TB)
    grid = (B_pad // TB,)

    # Single fused pad+cast pass over x (no ones-column concat; b1 is a bias
    # row in the kernel).  Padded rows are all-zero -> finite garbage outputs
    # that are sliced off below; never consume the padded slab directly.
    x_p = jnp.pad(x, ((0, B_pad - B), (0, k_pad - in_dim))).astype(cdt)

    precision = (jax.lax.Precision.HIGHEST if cdt == jnp.float32
                 else jax.lax.Precision.DEFAULT)

    itemsize = jnp.dtype(cdt).itemsize
    flops = 2 * B_pad * (k_pad * hidden + hidden * hidden + hidden * _OUT_PAD)
    bytes_accessed = (
        x_p.size * itemsize
        + (w1.size + prepped["w2"].size + prepped["w3t"].size) * itemsize
        + (prepped["b1"].size + prepped["b2"].size + prepped["b3c"].size) * 4
        + _OUT_PAD * B_pad * 4)

    const = lambda i: (0, 0)
    out_t = pl.pallas_call(
        functools.partial(_mlp_kernel, precision=precision),
        out_shape=jax.ShapeDtypeStruct((_OUT_PAD, B_pad), jnp.float32),
        grid=grid,
        in_specs=[
            pl.BlockSpec((TB, k_pad), lambda i: (i, 0)),     # batch-tiled x
            pl.BlockSpec((k_pad, hidden), const),            # params: constant
            pl.BlockSpec((hidden, hidden), const),            # index_map -> one
            pl.BlockSpec((_OUT_PAD, hidden), const),          # DMA, VMEM-resident
            pl.BlockSpec((1, hidden), const),                 # for the whole grid
            pl.BlockSpec((1, hidden), const),
            pl.BlockSpec((_OUT_PAD, 1), const),
        ],
        out_specs=pl.BlockSpec((_OUT_PAD, TB), lambda i: (0, i)),
        compiler_params=pltpu.CompilerParams(
            dimension_semantics=("parallel",),
        ),
        cost_estimate=pl.CostEstimate(
            flops=flops, transcendentals=0, bytes_accessed=bytes_accessed),
    )(x_p, w1, prepped["w2"], prepped["w3t"],
      prepped["b1"], prepped["b2"], prepped["b3c"])

    # Transposed, zero-padded kernel output -> (B, out_dim).  Cheap: reads
    # only 3 * B f32 of the (8, B_pad) slab.
    return out_t[:out_dim, :B].T


def init_params(key):
    """nn.Linear-style init (uniform(-1/sqrt(in), 1/sqrt(in))), weights (in, out)."""
    dims = [(7, 128), (128, 128), (128, 3)]
    params = {}
    keys = jax.random.split(key, 2 * len(dims))
    for i, (din, dout) in enumerate(dims):
        bound = 1.0 / (din ** 0.5)
        params[f"w{i + 1}"] = jax.random.uniform(
            keys[2 * i], (din, dout), jnp.float32, -bound, bound)
        params[f"b{i + 1}"] = jax.random.uniform(
            keys[2 * i + 1], (1, dout), jnp.float32, -bound, bound)
    return params


def _reference_forward(x, params, weights_dtype=jnp.float32):
    """Plain-JAX reference mirroring the kernel's compute dtypes (biases in f32)."""
    f32 = jnp.float32
    cdt = weights_dtype
    h1 = jnp.maximum(
        jnp.dot(x.astype(cdt), params["w1"].astype(cdt),
                preferred_element_type=f32) + params["b1"], 0.0)
    h2 = jnp.maximum(
        jnp.dot(h1.astype(cdt), params["w2"].astype(cdt),
                preferred_element_type=f32) + params["b2"], 0.0)
    return jnp.dot(h2.astype(cdt), params["w3"].astype(cdt),
                   preferred_element_type=f32) + params["b3"]


if __name__ == "__main__":
    key = jax.random.PRNGKey(0)
    k_param, k_x1, k_x2 = jax.random.split(key, 3)
    params = init_params(k_param)

    # --- small batch, fp32-weight path (precision=HIGHEST) ---
    x_small = jax.random.normal(k_x1, (10, 7), jnp.float32)
    prepped_f32 = prepare_params(params, weights_dtype=jnp.float32)
    out_f32 = jax.block_until_ready(direct_net_forward(x_small, prepped_f32))
    ref_f32 = _reference_forward(x_small, params, jnp.float32)
    assert out_f32.shape == (10, 3), out_f32.shape
    assert jnp.allclose(out_f32, ref_f32, atol=2e-3, rtol=2e-3), "fp32 mismatch"

    # --- larger batch, bf16-weight default path, multi-step grid + padding ---
    x_big = jax.random.normal(k_x2, (300, 7), jnp.float32)
    prepped_bf16 = prepare_params(params, weights_dtype=jnp.bfloat16)
    out_bf16 = jax.block_until_ready(
        direct_net_forward(x_big, prepped_bf16, block_b=128))   # grid of 3 tiles
    ref_bf16 = _reference_forward(x_big, params, jnp.bfloat16)
    assert out_bf16.shape == (300, 3), out_bf16.shape
    assert jnp.allclose(out_bf16, ref_bf16, atol=1e-2, rtol=1e-2), "bf16 mismatch"

    print("KERNEL_OK")
</pallas_src>

<mosaic_0001>
module attributes {stable_mosaic.version = 11 : i64} {
  func.func @_mlp_kernel(%arg0: i32, %arg1: memref<128x16xf32, #tpu.memory_space<vmem>>, %arg2: memref<16x128xf32, #tpu.memory_space<vmem>>, %arg3: memref<128x128xf32, #tpu.memory_space<vmem>>, %arg4: memref<8x128xf32, #tpu.memory_space<vmem>>, %arg5: memref<1x128xf32, #tpu.memory_space<vmem>>, %arg6: memref<1x128xf32, #tpu.memory_space<vmem>>, %arg7: memref<8x1xf32, #tpu.memory_space<vmem>>, %arg8: memref<8x128xf32, #tpu.memory_space<vmem>>) attributes {dimension_semantics = [#tpu.dimension_semantics<parallel>], iteration_bounds = array<i64: 1>, scalar_prefetch = 0 : i64, scratch_operands = 0 : i64, tpu.core_type = #tpu.core_type<tc>, window_params = [{transform_indices = @transform_0, window_bounds = array<i64: 128, 16>}, {pipeline_mode = #tpu.pipeline_mode<synchronous>, transform_indices = @transform_1, window_bounds = array<i64: 16, 128>}, {pipeline_mode = #tpu.pipeline_mode<synchronous>, transform_indices = @transform_2, window_bounds = array<i64: 128, 128>}, {pipeline_mode = #tpu.pipeline_mode<synchronous>, transform_indices = @transform_3, window_bounds = array<i64: 8, 128>}, {pipeline_mode = #tpu.pipeline_mode<synchronous>, transform_indices = @transform_4, window_bounds = array<i64: 1, 128>}, {pipeline_mode = #tpu.pipeline_mode<synchronous>, transform_indices = @transform_5, window_bounds = array<i64: 1, 128>}, {pipeline_mode = #tpu.pipeline_mode<synchronous>, transform_indices = @transform_6, window_bounds = array<i64: 8, 1>}, {transform_indices = @transform_7, window_bounds = array<i64: 8, 128>}]} {
    %c0 = arith.constant 0 : index
    %c0_0 = arith.constant 0 : index
    %0 = vector.load %arg1[%c0, %c0_0] : memref<128x16xf32, #tpu.memory_space<vmem>>, vector<128x16xf32>
    %c0_1 = arith.constant 0 : index
    %c0_2 = arith.constant 0 : index
    %1 = vector.load %arg2[%c0_1, %c0_2] : memref<16x128xf32, #tpu.memory_space<vmem>>, vector<16x128xf32>
    %cst = arith.constant dense<0.000000e+00> : vector<128x128xf32>
    %2 = tpu.matmul %0, %1, %cst {dimension_numbers = #tpu.dot_dimension_numbers<[1], [0], [0], [1], [0, 0, 1, 1], [], []>, precision = #tpu.contract_precision<fp32>} : vector<128x16xf32>, vector<16x128xf32>, vector<128x128xf32> -> vector<128x128xf32>
    %c0_3 = arith.constant 0 : index
    %c0_4 = arith.constant 0 : index
    %3 = vector.load %arg5[%c0_3, %c0_4] : memref<1x128xf32, #tpu.memory_space<vmem>>, vector<1x128xf32>
    %4 = vector.broadcast %3 : vector<1x128xf32> to vector<128x128xf32>
    %5 = arith.addf %2, %4 : vector<128x128xf32>
    %cst_5 = arith.constant 0.000000e+00 : f32
    %6 = vector.broadcast %cst_5 : f32 to vector<128x128xf32>
    %7 = arith.maximumf %5, %6 : vector<128x128xf32>
    %c0_6 = arith.constant 0 : index
    %c0_7 = arith.constant 0 : index
    %8 = vector.load %arg3[%c0_6, %c0_7] : memref<128x128xf32, #tpu.memory_space<vmem>>, vector<128x128xf32>
    %cst_8 = arith.constant dense<0.000000e+00> : vector<128x128xf32>
    %9 = tpu.matmul %7, %8, %cst_8 {dimension_numbers = #tpu.dot_dimension_numbers<[1], [0], [0], [1], [0, 0, 1, 1], [], []>, precision = #tpu.contract_precision<fp32>} : vector<128x128xf32>, vector<128x128xf32>, vector<128x128xf32> -> vector<128x128xf32>
    %c0_9 = arith.constant 0 : index
    %c0_10 = arith.constant 0 : index
    %10 = vector.load %arg6[%c0_9, %c0_10] : memref<1x128xf32, #tpu.memory_space<vmem>>, vector<1x128xf32>
    %11 = vector.broadcast %10 : vector<1x128xf32> to vector<128x128xf32>
    %12 = arith.addf %9, %11 : vector<128x128xf32>
    %cst_11 = arith.constant 0.000000e+00 : f32
    %13 = vector.broadcast %cst_11 : f32 to vector<128x128xf32>
    %14 = arith.maximumf %12, %13 : vector<128x128xf32>
    %c0_12 = arith.constant 0 : index
    %c0_13 = arith.constant 0 : index
    %15 = vector.load %arg4[%c0_12, %c0_13] : memref<8x128xf32, #tpu.memory_space<vmem>>, vector<8x128xf32>
    %16 = tpu.transpose %14, [1, 0] : vector<128x128xf32> -> vector<128x128xf32>
    %cst_14 = arith.constant dense<0.000000e+00> : vector<8x128xf32>
    %17 = tpu.matmul %15, %16, %cst_14 {dimension_numbers = #tpu.dot_dimension_numbers<[1], [0], [0], [1], [0, 0, 1, 1], [], []>, precision = #tpu.contract_precision<fp32>} : vector<8x128xf32>, vector<128x128xf32>, vector<8x128xf32> -> vector<8x128xf32>
    %c0_15 = arith.constant 0 : index
    %c0_16 = arith.constant 0 : index
    %18 = vector.load %arg7[%c0_15, %c0_16] : memref<8x1xf32, #tpu.memory_space<vmem>>, vector<8x1xf32>
    %19 = vector.broadcast %18 : vector<8x1xf32> to vector<8x128xf32>
    %20 = arith.addf %17, %19 : vector<8x128xf32>
    %c0_17 = arith.constant 0 : index
    %c0_18 = arith.constant 0 : index
    %21 = vector.load %arg8[%c0_17, %c0_18] : memref<8x128xf32, #tpu.memory_space<vmem>>, vector<8x128xf32>
    tpu.vector_store %arg8[%c0_17, %c0_18], %20 {strides = array<i32>} : memref<8x128xf32, #tpu.memory_space<vmem>>, vector<8x128xf32>,
    return
  }
  func.func @transform_0(%arg0: i32) -> (i32, i32) {
    %c0_i32 = arith.constant 0 : i32
    %c0_i32_0 = arith.constant 0 : i32
    return %arg0, %c0_i32 : i32, i32
  }
  func.func @transform_1(%arg0: i32) -> (i32, i32) {
    %c0_i32 = arith.constant 0 : i32
    %c0_i32_0 = arith.constant 0 : i32
    %c0_i32_1 = arith.constant 0 : i32
    return %c0_i32, %c0_i32_0 : i32, i32
  }
  func.func @transform_2(%arg0: i32) -> (i32, i32) {
    %c0_i32 = arith.constant 0 : i32
    %c0_i32_0 = arith.constant 0 : i32
    %c0_i32_1 = arith.constant 0 : i32
    return %c0_i32, %c0_i32_0 : i32, i32
  }
  func.func @transform_3(%arg0: i32) -> (i32, i32) {
    %c0_i32 = arith.constant 0 : i32
    %c0_i32_0 = arith.constant 0 : i32
    %c0_i32_1 = arith.constant 0 : i32
    return %c0_i32, %c0_i32_0 : i32, i32
  }
  func.func @transform_4(%arg0: i32) -> (i32, i32) {
    %c0_i32 = arith.constant 0 : i32
    %c0_i32_0 = arith.constant 0 : i32
    %c0_i32_1 = arith.constant 0 : i32
    return %c0_i32, %c0_i32_0 : i32, i32
  }
  func.func @transform_5(%arg0: i32) -> (i32, i32) {
    %c0_i32 = arith.constant 0 : i32
    %c0_i32_0 = arith.constant 0 : i32
    %c0_i32_1 = arith.constant 0 : i32
    return %c0_i32, %c0_i32_0 : i32, i32
  }
  func.func @transform_6(%arg0: i32) -> (i32, i32) {
    %c0_i32 = arith.constant 0 : i32
    %c0_i32_0 = arith.constant 0 : i32
    %c0_i32_1 = arith.constant 0 : i32
    return %c0_i32, %c0_i32_0 : i32, i32
  }
  func.func @transform_7(%arg0: i32) -> (i32, i32) {
    %c0_i32 = arith.constant 0 : i32
    %c0_i32_0 = arith.constant 0 : i32
    return %c0_i32, %arg0 : i32, i32
  }
}

</mosaic_0001>

<bundles_post_ra>
// kernel: tpu_custom_call.1
= control target key start
LH: loop header
LB: loop body
LE: loop exit
PB: predicated region body
PF: predicated region fallthrough
CT: control target
= control target key end

     0   :  { %vm49_vm0 = vcmask 130048   ;;  %s3149_s0 = inlined_call_operand.vmem [shape: f32[128,16], index: 0, kind: input, shape index: {}]   ;;  %s3150_s1 = inlined_call_operand.vmem [shape: f32[16,128], index: 1, kind: input, shape index: {}]   ;;  %s3151_s2 = inlined_call_operand.vmem [shape: f32[128,128], index: 2, kind: input, shape index: {}]   ;;  %s3152_s3 = inlined_call_operand.vmem [shape: f32[8,128], index: 3, kind: input, shape index: {}]   ;;  %s3153_s4 = inlined_call_operand.vmem [shape: f32[1,128], index: 4, kind: input, shape index: {}]   ;;  %s3154_s5 = inlined_call_operand.vmem [shape: f32[1,128], index: 5, kind: input, shape index: {}]   ;;  %s3155_s6 = inlined_call_operand.vmem [shape: f32[8,1], index: 6, kind: input, shape index: {}]   ;;  %s3156_s7 = inlined_call_operand.hbm [shape: f32[8,128], index: 7, kind: output, shape index: {}]  }
   0x1   :  { %v44_v0 = vld [vmem:[%s3150_s1 + $0x8] sm:$0xff]  ;;  %v43_v1 = vld [vmem:[%s3150_s1] sm:$0xff]  ;;  %v29_v13 = vld [vmem:[%s3149_s0 + $0x10] sm:$0xff] }
   0x2   :  { %v27_v2 = vld [vmem:[%s3149_s0] sm:$0xff]  ;;  %v2031_v3 = vand.u32 4294901760, %v44_v0  ;;  %v2033_v4 = vand.u32 4294901760, %v43_v1  ;;  %v28_v7 = vld [vmem:[%s3149_s0 + $0x8] sm:$0xff]  ;;  %v41_v14 = vld [vmem:[%s3149_s0 + $0x70] sm:$0xff]  ;;  %v57_v21 = vsel %vm49_vm0, %v29_v13, 0 }
   0x3   :  { %v51_v5 = vsel %vm49_vm0, %v27_v2, 0  ;;  %v39_v6 = vld [vmem:[%s3149_s0 + $0x60] sm:$0xff]  ;;  %v40_v8 = vld [vmem:[%s3149_s0 + $0x68] sm:$0xff]  ;;  %v54_v11 = vsel %vm49_vm0, %v28_v7, 0  ;;  %v93_v22 = vsel %vm49_vm0, %v41_v14, 0 }
   0x4   :  { %v2045_v9 = vand.u32 4294901760, %v51_v5  ;;  %v87_v10 = vsel %vm49_vm0, %v39_v6, 0  ;;  %v90_v12 = vsel %vm49_vm0, %v40_v8, 0  ;;  %113 = vmatpush.msra.mxu0 %v2031_v3  ;;  %1945 = vmatpush.msra.mxu2 %v2031_v3  ;;  %v260_v15 = vsub.f32 %v44_v0, %v2031_v3 }
   0x5   :  { %v2059_v16 = vand.u32 4294901760, %v87_v10  ;;  %v266_v17 = vsub.f32 %v43_v1, %v2033_v4  ;;  %v2062_v18 = vand.u32 4294901760, %v54_v11  ;;  %v2067_v20 = vand.u32 4294901760, %v90_v12 }
   0x6   :  { %v2065_v19 = vsub.f32 %v51_v5, %v2045_v9  ;;  %115 = vmatpush.msra.mxu0 %v2033_v4  ;;  %1946 = vmatpush.msra.mxu2 %v2033_v4  ;;  %v261_v23 = vand.u32 4294901760, %v260_v15 }
   0x7   :  { %v2074_v24 = vsub.f32 %v87_v10, %v2059_v16  ;;  %v267_v25 = vand.u32 4294901760, %v266_v17  ;;  %v2077_v26 = vsub.f32 %v54_v11, %v2062_v18 }
   0x8   :  { %12 = vsyncpa [#allocation3], 0  ;;  %v118_v27 = vand.u32 4294901760, %v2065_v19  ;;  %v2081_v28 = vsub.f32 %v90_v12, %v2067_v20  ;;  %352 = vmatpush.msrb.mxu2 %v260_v15  ;;  %v262_v29 = vsub.f32 %v260_v15, %v261_v23  ;;  %569 = vmatpush.msrb.mxu0 %v261_v23  ;;  %v2088_v34 = vand.u32 4294901760, %v57_v21  ;;  %v30_v41 = vld [vmem:[%s3149_s0 + $0x18] sm:$0xff]  ;;  %v31_v56 = vld [vmem:[%s3149_s0 + $0x20] sm:$0xff] }
   0x9   :  { %v214_v30 = vand.u32 4294901760, %v2074_v24  ;;  %v268_v31 = vsub.f32 %v266_v17, %v267_v25  ;;  %v126_v33 = vand.u32 4294901760, %v2077_v26  ;;  %v2090_v35 = vand.u32 4294901760, %v93_v22  ;;  %v42_v43 = vld [vmem:[%s3149_s0 + $0x78] sm:$0xff]  ;;  %v33_v13 = vld [vmem:[%s3149_s0 + $0x30] sm:$0xff]  ;;  %s1936_s25 = sshll.u32 %s3156_s7, 4  ;;  %s1937_s25 = int_to_ptr.hbm [resolvable:$true] %s1936_s25 }
   0xa   :  { %v119_v32 = vsub.f32 %v2065_v19, %v118_v27  ;;  %355 = vmatpush.msrb.mxu2 %v266_v17  ;;  %v263_v36 = vand.u32 4294901760, %v262_v29  ;;  %v222_v39 = vand.u32 4294901760, %v2081_v28  ;;  %573 = vmatpush.msrb.mxu0 %v267_v25  ;;  %v2106_v45 = vsub.f32 %v57_v21, %v2088_v34  ;;  %v34_v25 = vld [vmem:[%s3149_s0 + $0x38] sm:$0xff] }
   0xb   :  { %v215_v37 = vsub.f32 %v2074_v24, %v214_v30  ;;  %v269_v38 = vand.u32 4294901760, %v268_v31  ;;  %v127_v44 = vsub.f32 %v2077_v26, %v126_v33  ;;  %v2112_v47 = vsub.f32 %v93_v22, %v2090_v35 }
   0xc   :  { %v120_v40 = vand.u32 4294901760, %v119_v32  ;;  %264 = vmatpush.msra.mxu1 %v263_v36  ;;  %1947 = vmatpush.msra.mxu3 %v263_v36  ;;  %v223_v46 = vsub.f32 %v2081_v28, %v222_v39  ;;  %v60_v48 = vsel %vm49_vm0, %v30_v41, 0  ;;  %v96_v49 = vsel %vm49_vm0, %v42_v43, 0 }
   0xd   :  { %v216_v42 = vand.u32 4294901760, %v215_v37  ;;  %v128_v50 = vand.u32 4294901760, %v127_v44  ;;  %v134_v51 = vand.u32 4294901760, %v2106_v45  ;;  %v2120_v52 = vand.u32 4294901760, %v60_v48 }
   0xe   :  { %121 = vmatmul.f32.vlgmr.msra.gmra.mxu0 %v120_v40  ;;  %270 = vmatpush.msra.mxu1 %v269_v38  ;;  %v224_v53 = vand.u32 4294901760, %v223_v46  ;;  %v230_v54 = vand.u32 4294901760, %v2112_v47  ;;  %v2124_v55 = vand.u32 4294901760, %v96_v49  ;;  %v63_v61 = vsel %vm49_vm0, %v31_v56, 0  ;;  %v35_v40 = vld [vmem:[%s3149_s0 + $0x40] sm:$0xff]  ;;  %v36_v46 = vld [vmem:[%s3149_s0 + $0x48] sm:$0xff] }
   0xf   :  { %217 = vmatmul.f32.vlgmr.msra.gmra.mxu2 %v216_v42  ;;  %1948 = vmatpush.msra.mxu3 %v269_v38  ;;  %v135_v57 = vsub.f32 %v2106_v45, %v134_v51  ;;  %v2135_v58 = vsub.f32 %v60_v48, %v2120_v52  ;;  %v2147_v0 = vand.u32 4294901760, %v63_v61  ;;  %v69_v17 = vsel %vm49_vm0, %v33_v13, 0  ;;  %v37_v56 = vld [vmem:[%s3149_s0 + $0x50] sm:$0xff] }
  0x10   :  { %272 = vmatmul.f32.vlgmr.msra.gmra.mxu1 %v2045_v9  ;;  %320 = vmatmul.f32.vlgmr.msra.gmra.mxu3 %v2059_v16  ;;  %v231_v59 = vsub.f32 %v2112_v47, %v230_v54  ;;  %v2141_v60 = vsub.f32 %v96_v49, %v2124_v55  ;;  %v2181_v23 = vand.u32 4294901760, %v69_v17  ;;  %v72_v32 = vsel %vm49_vm0, %v34_v25, 0 }
  0x11   :  { %654 = vmatpush.msrb.mxu1 %v2031_v3  ;;  %452 = vmatpush.msrb.mxu3 %v2031_v3  ;;  %v136_v62 = vand.u32 4294901760, %v135_v57  ;;  %v142_v63 = vand.u32 4294901760, %v2135_v58  ;;  %v32_v3 = vld [vmem:[%s3149_s0 + $0x28] sm:$0xff]  ;;  %v2157_v5 = vsub.f32 %v63_v61, %v2147_v0  ;;  %v2196_v38 = vand.u32 4294901760, %v72_v32 }
  0x12   :  { %v232_v1 = vand.u32 4294901760, %v231_v59  ;;  %v238_v2 = vand.u32 4294901760, %v2141_v60  ;;  %v66_v7 = vsel %vm49_vm0, %v32_v3, 0  ;;  %v2188_v31 = vsub.f32 %v69_v17, %v2181_v23 }
  0x13   :  { %656 = vmatpush.msrb.mxu1 %v2033_v4  ;;  %454 = vmatpush.msrb.mxu3 %v2033_v4  ;;  %v143_v4 = vsub.f32 %v2135_v58, %v142_v63  ;;  %v150_v10 = vand.u32 4294901760, %v2157_v5  ;;  %v2166_v11 = vand.u32 4294901760, %v66_v7  ;;  %v173_v42 = vsub.f32 %v72_v32, %v2196_v38 }
  0x14   :  { %v239_v6 = vsub.f32 %v2141_v60, %v238_v2  ;;  %v166_v37 = vand.u32 4294901760, %v2188_v31  ;;  %v75_v43 = vsel %vm49_vm0, %v35_v40, 0  ;;  %v81_v61 = vsel %vm49_vm0, %v37_v56, 0 }
  0x15   :  { %v144_v8 = vand.u32 4294901760, %v143_v4  ;;  %v151_v14 = vsub.f32 %v2157_v5, %v150_v10  ;;  %v2175_v15 = vsub.f32 %v66_v7, %v2166_v11  ;;  %v2208_v44 = vand.u32 4294901760, %v75_v43 }
  0x16   :  { %129 = vmatmul.f32.gmra.mxu0 %v128_v50  ;;  %v240_v12 = vand.u32 4294901760, %v239_v6  ;;  %v167_v41 = vsub.f32 %v2188_v31, %v166_v37  ;;  %v78_v50 = vsel %vm49_vm0, %v36_v46, 0 }
  0x17   :  { %225 = vmatmul.f32.gmra.mxu2 %v224_v53  ;;  %v152_v21 = vand.u32 4294901760, %v151_v14  ;;  %v158_v22 = vand.u32 4294901760, %v2175_v15  ;;  %v181_v49 = vsub.f32 %v75_v43, %v2208_v44  ;;  %v2219_v53 = vand.u32 4294901760, %v78_v50 }
  0x18   :  { %276 = vmatmul.f32.gmra.mxu1 %v2062_v18  ;;  %324 = vmatmul.f32.gmra.mxu3 %v2067_v20 }
  0x19   :  { %v159_v29 = vsub.f32 %v2175_v15, %v158_v22  ;;  %v189_v59 = vsub.f32 %v78_v50, %v2219_v53 }
  0x1b   :  { %v160_v36 = vand.u32 4294901760, %v159_v29 }
  0x1e   :  { %137 = vmatmul.f32.gmra.mxu0 %v136_v62  ;;  %v2230_v62 = vand.u32 4294901760, %v81_v61 }
  0x1f   :  { %233 = vmatmul.f32.gmra.mxu2 %v232_v1  ;;  %v38_v1 = vld [vmem:[%s3149_s0 + $0x58] sm:$0xff] }
  0x20   :  { %280 = vmatmul.f32.gmra.mxu1 %v2088_v34  ;;  %328 = vmatmul.f32.gmra.mxu3 %v2090_v35  ;;  %v197_v4 = vsub.f32 %v81_v61, %v2230_v62  ;;  %v84_v6 = vsel %vm49_vm0, %v38_v1, 0  ;;  %v747_v1 = vld [vmem:[%s3151_s2 + $0x48] sm:$0xff] }
  0x21   :  { %v2241_v7 = vand.u32 4294901760, %v84_v6 }
  0x26   :  { %145 = vmatmul.f32.gmra.mxu0 %v144_v8 }
  0x27   :  { %241 = vmatmul.f32.gmra.mxu2 %v240_v12  ;;  %v205_v12 = vsub.f32 %v84_v6, %v2241_v7 }
  0x28   :  { %284 = vmatmul.f32.gmra.mxu1 %v2120_v52  ;;  %332 = vmatmul.f32.gmra.mxu3 %v2124_v55 }
  0x29   :  { %v206_v14 = vand.u32 4294901760, %v205_v12 }
  0x2b   :  { %v207_v17 = vsub.f32 %v205_v12, %v206_v14 }
  0x2e   :  { %153 = vmatmul.f32.gmra.mxu0 %v152_v21 }
  0x2f   :  { %358 = vmatmul.f32.vlgmr.msrb.gmra.mxu2 %v2065_v19  ;;  %v168_v19 = vand.u32 4294901760, %v167_v41 }
  0x30   :  { %288 = vmatmul.f32.gmra.mxu1 %v2147_v0  ;;  %458 = vmatmul.f32.vlgmr.msrb.gmra.mxu3 %v118_v27  ;;  %v174_v27 = vand.u32 4294901760, %v173_v42 }
  0x32   :  { %v175_v48 = vsub.f32 %v173_v42, %v174_v27 }
  0x36   :  { %161 = vmatmul.f32.gmra.mxu0 %v160_v36 }
  0x37   :  { %363 = vmatmul.f32.gmra.mxu2 %v2077_v26  ;;  %v176_v26 = vand.u32 4294901760, %v175_v48  ;;  %v749_v48 = vld [vmem:[%s3151_s2 + $0x58] sm:$0xff] }
  0x38   :  { %292 = vmatmul.f32.gmra.mxu1 %v2166_v11  ;;  %464 = vmatmul.f32.gmra.mxu3 %v126_v33  ;;  %v182_v33 = vand.u32 4294901760, %v181_v49  ;;  %v2365_v50 = vand.u32 4294901760, %v749_v48 }
  0x3a   :  { %v183_v57 = vsub.f32 %v181_v49, %v182_v33  ;;  %v2382_v61 = vsub.f32 %v749_v48, %v2365_v50 }
  0x3e   :  { %169 = vmatmul.f32.gmra.mxu0 %v168_v19  ;;  %v750_v19 = vld [vmem:[%s3151_s2 + $0x60] sm:$0xff] }
  0x3f   :  { %368 = vmatmul.f32.gmra.mxu2 %v2106_v45  ;;  %v184_v45 = vand.u32 4294901760, %v183_v57  ;;  %v748_v57 = vld [vmem:[%s3151_s2 + $0x50] sm:$0xff] }
  0x40   :  { %296 = vmatmul.f32.gmra.mxu1 %v2181_v23  ;;  %470 = vmatmul.f32.gmra.mxu3 %v134_v51  ;;  %v190_v51 = vand.u32 4294901760, %v189_v59 }
  0x42   :  { %v191_v3 = vsub.f32 %v189_v59, %v190_v51 }
  0x46   :  { %177 = vmatmul.f32.gmra.mxu0 %v176_v26 }
  0x47   :  { %373 = vmatmul.f32.gmra.mxu2 %v2135_v58  ;;  %v192_v58 = vand.u32 4294901760, %v191_v3 }
  0x48   :  { %300 = vmatmul.f32.gmra.mxu1 %v2196_v38  ;;  %476 = vmatmul.f32.gmra.mxu3 %v142_v63  ;;  %v198_v63 = vand.u32 4294901760, %v197_v4 }
  0x4a   :  { %v199_v8 = vsub.f32 %v197_v4, %v198_v63 }
  0x4c   :  { %v200_v13 = vand.u32 4294901760, %v199_v8 }
  0x4e   :  { %185 = vmatmul.f32.gmra.mxu0 %v184_v45  ;;  %v2384_v45 = vand.u32 4294901760, %v748_v57 }
  0x4f   :  { %378 = vmatmul.f32.gmra.mxu2 %v2157_v5  ;;  %v208_v5 = vand.u32 4294901760, %v207_v17 }
  0x50   :  { %304 = vmatmul.f32.gmra.mxu1 %v2208_v44  ;;  %482 = vmatmul.f32.gmra.mxu3 %v150_v10  ;;  %v2397_v6 = vsub.f32 %v748_v57, %v2384_v45 }
  0x56   :  { %193 = vmatmul.f32.gmra.mxu0 %v192_v58  ;;  %v2399_v58 = vand.u32 4294901760, %v747_v1 }
  0x57   :  { %383 = vmatmul.f32.gmra.mxu2 %v2175_v15 }
  0x58   :  { %308 = vmatmul.f32.gmra.mxu1 %v2219_v53  ;;  %488 = vmatmul.f32.gmra.mxu3 %v158_v22 }
  0x5e   :  { %201 = vmatmul.f32.gmra.mxu0 %v200_v13  ;;  %v2411_v13 = vsub.f32 %v747_v1, %v2399_v58 }
  0x5f   :  { %388 = vmatmul.f32.gmra.mxu2 %v2188_v31 }
  0x60   :  { %312 = vmatmul.f32.gmra.mxu1 %v2230_v62  ;;  %494 = vmatmul.f32.gmra.mxu3 %v166_v37 }
  0x66   :  { %209 = vmatmul.f32.gmra.mxu0 %v208_v5 }
  0x67   :  { %393 = vmatmul.f32.gmra.mxu2 %v173_v42 }
  0x68   :  { %316 = vmatmul.f32.gmra.mxu1 %v2241_v7  ;;  %500 = vmatmul.f32.gmra.mxu3 %v174_v27  ;;  %v2351_v27 = vand.u32 4294901760, %v750_v19 }
  0x6e   :  { %575 = vmatmul.f32.vlgmr.msrb.gmra.mxu0 %v2045_v9 }
  0x6f   :  { %398 = vmatmul.f32.gmra.mxu2 %v181_v49  ;;  %v2363_v49 = vsub.f32 %v750_v19, %v2351_v27  ;;  %v744_v19 = vld [vmem:[%s3151_s2 + $0x30] sm:$0xff] }
  0x70   :  { %658 = vmatmul.f32.vlgmr.msrb.gmra.mxu1 %v2045_v9  ;;  %506 = vmatmul.f32.gmra.mxu3 %v182_v33  ;;  %v2446_v57 = vand.u32 4294901760, %v744_v19 }
  0x76   :  { %579 = vmatmul.f32.gmra.mxu0 %v2062_v18 }
  0x77   :  { %403 = vmatmul.f32.gmra.mxu2 %v189_v59  ;;  %v3162_v59 = vand.u32 4294901760, %v2363_v49 }
  0x78   :  { %662 = vmatmul.f32.gmra.mxu1 %v2062_v18  ;;  %512 = vmatmul.f32.gmra.mxu3 %v190_v51 }
  0x79   :  { %v940_v3 = vsub.f32 %v2363_v49, %v3162_v59 }
  0x7e   :  { %583 = vmatmul.f32.gmra.mxu0 %v2088_v34 }
  0x7f   :  { %408 = vmatmul.f32.gmra.mxu2 %v197_v4  ;;  %v3160_v4 = vand.u32 4294901760, %v2382_v61 }
  0x80   :  { %666 = vmatmul.f32.gmra.mxu1 %v2088_v34  ;;  %518 = vmatmul.f32.gmra.mxu3 %v198_v63  ;;  %v941_v63 = vand.u32 4294901760, %v940_v3 }
  0x81   :  { %v946_v8 = vsub.f32 %v2382_v61, %v3160_v4 }
  0x86   :  { %587 = vmatmul.f32.gmra.mxu0 %v2120_v52 }
  0x87   :  { %413 = vmatmul.f32.gmra.mxu2 %v205_v12  ;;  %v3159_v12 = vand.u32 4294901760, %v2397_v6 }
  0x88   :  { %670 = vmatmul.f32.gmra.mxu1 %v2120_v52  ;;  %524 = vmatmul.f32.gmra.mxu3 %v206_v14 }
  0x8b   :  { %v2257_v9 = vpop.f32.mrf.mxu0 }
  0x8d   :  { %v2259_v10 = vpop.f32.mrf.mxu1 }
  0x8e   :  { %591 = vmatmul.f32.gmra.mxu0 %v2147_v0 }
  0x8f   :  { %418 = vmatmul.f32.gmra.mxu2 %v2074_v24  ;;  %v753_v24 = vld [vmem:[%s3151_s2 + $0x78] sm:$0xff] }
  0x90   :  { %674 = vmatmul.f32.gmra.mxu1 %v2147_v0  ;;  %530 = vmatmul.f32.gmra.mxu3 %v214_v30  ;;  %v2286_v30 = vand.u32 4294901760, %v753_v24 }
  0x92   :  { %v2277_v15 = vpop.f32.mrf.mxu2  ;;  %759 = vmatpush.msra.mxu2 %v2286_v30  ;;  %1210 = vmatpush.msra.mxu1 %v2286_v30 }
  0x93   :  { %v2266_v18 = vpop.f32.mrf.mxu0  ;;  %3171 = vst [vmem:[#allocation5_spill] sm:$0xff] %v2277_v15 }
  0x95   :  { %v2268_v34 = vpop.f32.mrf.mxu1 }
  0x96   :  { %595 = vmatmul.f32.gmra.mxu0 %v2166_v11 }
  0x97   :  { %423 = vmatmul.f32.gmra.mxu2 %v2081_v28  ;;  %v2289_v28 = vpop.f32.mrf.mxu3 }
  0x98   :  { %678 = vmatmul.f32.gmra.mxu1 %v2166_v11  ;;  %536 = vmatmul.f32.gmra.mxu3 %v222_v39  ;;  %3172 = vst [vmem:[#allocation6_spill] sm:$0xff] %v2289_v28  ;;  %v2295_v39 = vsub.f32 %v753_v24, %v2286_v30  ;;  %v745_v24 = vld [vmem:[%s3151_s2 + $0x38] sm:$0xff] }
  0x9a   :  { %v3166_v21 = vand.u32 4294901760, %v2295_v39  ;;  %1082 = vmatpush.msra.mxu0 %v2295_v39 }
  0x9b   :  { %v2275_v52 = vpop.f32.mrf.mxu0 }
  0x9d   :  { %v2279_v0 = vpop.f32.mrf.mxu1 }
  0x9e   :  { %599 = vmatmul.f32.gmra.mxu0 %v2181_v23 }
  0x9f   :  { %428 = vmatmul.f32.gmra.mxu2 %v2112_v47  ;;  %v922_v47 = vsub.f32 %v2295_v39, %v3166_v21  ;;  %v2324_v32 = vpop.f32.mrf.mxu3 }
  0xa0   :  { %682 = vmatmul.f32.gmra.mxu1 %v2181_v23  ;;  %542 = vmatmul.f32.gmra.mxu3 %v230_v54  ;;  %v752_v54 = vld [vmem:[%s3151_s2 + $0x70] sm:$0xff]  ;;  %v2311_v23 = vpop.f32.mrf.mxu2  ;;  %3174 = vst [vmem:[#allocation8_spill] sm:$0xff] %v2324_v32 }
  0xa1   :  { %3173 = vst [vmem:[#allocation7_spill] sm:$0xff] %v2311_v23  ;;  %v923_v25 = vand.u32 4294901760, %v922_v47  ;;  %v2314_v29 = vand.u32 4294901760, %v752_v54  ;;  %v947_v47 = vand.u32 4294901760, %v946_v8  ;;  %v2461_v8 = vsub.f32 %v744_v19, %v2446_v57 }
  0xa3   :  { %v2298_v11 = vpop.f32.mrf.mxu0  ;;  %761 = vmatpush.msra.mxu2 %v2314_v29  ;;  %v2321_v31 = vsub.f32 %v752_v54, %v2314_v29  ;;  %924 = vmatpush.msra.mxu3 %v923_v25  ;;  %v952_v54 = vsub.f32 %v2397_v6, %v3159_v12  ;;  %v3158_v25 = vand.u32 4294901760, %v2411_v13  ;;  %v3165_v19 = vand.u32 4294901760, %v2461_v8 }
  0xa4   :  { %1212 = vmatpush.msra.mxu1 %v2314_v29 }
  0xa5   :  { %v2302_v22 = vpop.f32.mrf.mxu1  ;;  %v3164_v37 = vand.u32 4294901760, %v2321_v31  ;;  %1085 = vmatpush.msra.mxu0 %v2321_v31  ;;  %v953_v48 = vand.u32 4294901760, %v952_v54 }
  0xa6   :  { %603 = vmatmul.f32.gmra.mxu0 %v2196_v38 }
  0xa7   :  { %433 = vmatmul.f32.gmra.mxu2 %v2141_v60  ;;  %v928_v60 = vsub.f32 %v2321_v31, %v3164_v37  ;;  %v2368_v26 = vpop.f32.mrf.mxu3 }
  0xa8   :  { %686 = vmatmul.f32.gmra.mxu1 %v2196_v38  ;;  %548 = vmatmul.f32.gmra.mxu3 %v238_v2  ;;  %v751_v2 = vld [vmem:[%s3151_s2 + $0x68] sm:$0xff]  ;;  %v2342_v42 = vpop.f32.mrf.mxu2  ;;  %3176 = vst [vmem:[#allocation10_spill] sm:$0xff] %v2368_v26 }
  0xa9   :  { %v929_v40 = vand.u32 4294901760, %v928_v60  ;;  %v2339_v41 = vand.u32 4294901760, %v751_v2  ;;  %3175 = vst [vmem:[#allocation9_spill] sm:$0xff] %v2342_v42 }
  0xab   :  { %v2326_v36 = vpop.f32.mrf.mxu0  ;;  %930 = vmatpush.msra.mxu3 %v929_v40  ;;  %763 = vmatpush.msra.mxu2 %v2339_v41  ;;  %v2346_v43 = vsub.f32 %v751_v2, %v2339_v41  ;;  %v2436_v40 = vand.u32 4294901760, %v745_v24 }
  0xac   :  { %1214 = vmatpush.msra.mxu1 %v2339_v41 }
  0xad   :  { %v2330_v38 = vpop.f32.mrf.mxu1  ;;  %1088 = vmatpush.msra.mxu0 %v2346_v43  ;;  %765 = vmatpush.msra.mxu2 %v2351_v27  ;;  %v2452_v3 = vsub.f32 %v745_v24, %v2436_v40 }
  0xae   :  { %607 = vmatmul.f32.gmra.mxu0 %v2208_v44  ;;  %1216 = vmatpush.msra.mxu1 %v2351_v27 }
  0xaf   :  { %767 = vmatpush.msra.mxu2 %v2365_v50  ;;  %1091 = vmatpush.msra.mxu0 %v2363_v49  ;;  %v3161_v54 = vand.u32 4294901760, %v2452_v3 }
  0xb0   :  { %690 = vmatmul.f32.gmra.mxu1 %v2208_v44  ;;  %v3163_v44 = vand.u32 4294901760, %v2346_v43  ;;  %v2415_v14 = vpop.f32.mrf.mxu2 }
  0xb1   :  { %1218 = vmatpush.msra.mxu1 %v2365_v50  ;;  %769 = vmatpush.msra.mxu2 %v2384_v45  ;;  %3177 = vst [vmem:[#allocation11_spill] sm:$0xff] %v2415_v14  ;;  %v970_v12 = vsub.f32 %v2452_v3, %v3161_v54 }
  0xb2   :  { %v934_v56 = vsub.f32 %v2346_v43, %v3163_v44  ;;  %1094 = vmatpush.msra.mxu0 %v2382_v61 }
  0xb3   :  { %v2354_v46 = vpop.f32.mrf.mxu0  ;;  %1220 = vmatpush.msra.mxu1 %v2384_v45  ;;  %771 = vmatpush.msra.mxu2 %v2399_v58  ;;  %v971_v44 = vand.u32 4294901760, %v970_v12 }
  0xb4   :  { %v935_v51 = vand.u32 4294901760, %v934_v56  ;;  %1097 = vmatpush.msra.mxu0 %v2397_v6  ;;  %v958_v56 = vsub.f32 %v2411_v13, %v3158_v25 }
  0xb5   :  { %v2370_v33 = vpop.f32.mrf.mxu1  ;;  %1222 = vmatpush.msra.mxu1 %v2399_v58 }
  0xb6   :  { %611 = vmatmul.f32.gmra.mxu0 %v2219_v53  ;;  %936 = vmatpush.msra.mxu3 %v935_v51  ;;  %v2448_v51 = vpop.f32.mrf.mxu3 }
  0xb7   :  { %1100 = vmatpush.msra.mxu0 %v2411_v13  ;;  %3178 = vst [vmem:[#allocation12_spill] sm:$0xff] %v2448_v51 }
  0xb8   :  { %694 = vmatmul.f32.gmra.mxu1 %v2219_v53  ;;  %v746_v53 = vld [vmem:[%s3151_s2 + $0x40] sm:$0xff]  ;;  %942 = vmatpush.msra.mxu3 %v941_v63  ;;  %v959_v63 = vand.u32 4294901760, %v958_v56  ;;  %v2499_v54 = vpop.f32.mrf.mxu2 }
  0xb9   :  { %v2420_v5 = vand.u32 4294901760, %v746_v53 }
  0xba   :  { %948 = vmatpush.msra.mxu3 %v947_v47 }
  0xbb   :  { %v2417_v17 = vpop.f32.mrf.mxu0  ;;  %v2433_v2 = vsub.f32 %v746_v53, %v2420_v5  ;;  %773 = vmatpush.msra.mxu2 %v2420_v5  ;;  %1224 = vmatpush.msra.mxu1 %v2420_v5  ;;  %v743_v53 = vld [vmem:[%s3151_s2 + $0x28] sm:$0xff] }
  0xbc   :  { %954 = vmatpush.msra.mxu3 %v953_v48  ;;  %v2463_v47 = vand.u32 4294901760, %v743_v53 }
  0xbd   :  { %v2430_v60 = vpop.f32.mrf.mxu1  ;;  %v3157_v1 = vand.u32 4294901760, %v2433_v2  ;;  %1103 = vmatpush.msra.mxu0 %v2433_v2  ;;  %1226 = vmatpush.msra.mxu1 %v2436_v40 }
  0xbe   :  { %615 = vmatmul.f32.gmra.mxu0 %v2230_v62  ;;  %960 = vmatpush.msra.mxu3 %v959_v63  ;;  %v2476_v48 = vsub.f32 %v743_v53, %v2463_v47  ;;  %v741_v53 = vld [vmem:[%s3151_s2 + $0x18] sm:$0xff]  ;;  %v976_v63 = vsub.f32 %v2461_v8, %v3165_v19  ;;  %v740_v19 = vld [vmem:[%s3151_s2 + $0x10] sm:$0xff] }
  0xbf   :  { %v964_v24 = vsub.f32 %v2433_v2, %v3157_v1  ;;  %1106 = vmatpush.msra.mxu0 %v2452_v3  ;;  %775 = vmatpush.msra.mxu2 %v2436_v40  ;;  %v2504_v37 = vand.u32 4294901760, %v741_v53 }
  0xc0   :  { %698 = vmatmul.f32.gmra.mxu1 %v2230_v62  ;;  %v742_v62 = vld [vmem:[%s3151_s2 + $0x20] sm:$0xff]  ;;  %v3167_v4 = vand.u32 4294901760, %v2476_v48 }
  0xc1   :  { %v2478_v56 = vand.u32 4294901760, %v742_v62  ;;  %v965_v25 = vand.u32 4294901760, %v964_v24  ;;  %1109 = vmatpush.msra.mxu0 %v2461_v8  ;;  %1228 = vmatpush.msra.mxu1 %v2446_v57  ;;  %v2516_v12 = vsub.f32 %v741_v53, %v2504_v37  ;;  %v2531_v53 = vpop.f32.mrf.mxu3 }
  0xc2   :  { %777 = vmatpush.msra.mxu2 %v2446_v57  ;;  %v982_v21 = vsub.f32 %v2476_v48, %v3167_v4 }
  0xc3   :  { %v2481_v1 = vpop.f32.mrf.mxu0  ;;  %v2496_v24 = vsub.f32 %v742_v62, %v2478_v56  ;;  %966 = vmatpush.msra.mxu3 %v965_v25  ;;  %1112 = vmatpush.msra.mxu0 %v2476_v48  ;;  %v977_v62 = vand.u32 4294901760, %v976_v63  ;;  %v2519_v25 = vand.u32 4294901760, %v740_v19  ;;  %v739_v63 = vld [vmem:[%s3151_s2 + $0x8] sm:$0xff] }
  0xc4   :  { %1230 = vmatpush.msra.mxu1 %v2463_v47  ;;  %v983_v14 = vand.u32 4294901760, %v982_v21  ;;  %779 = vmatpush.msra.mxu2 %v2463_v47 }
  0xc5   :  { %v2501_v59 = vpop.f32.mrf.mxu1  ;;  %v3168_v51 = vand.u32 4294901760, %v2496_v24  ;;  %972 = vmatpush.msra.mxu3 %v971_v44  ;;  %1115 = vmatpush.msra.mxu0 %v2496_v24  ;;  %v2529_v44 = vand.u32 4294901760, %v739_v63  ;;  %v2535_v42 = vsub.f32 %v740_v19, %v2519_v25  ;;  %v3180_v19 = vand.u32 4294901760, %v2516_v12 }
  0xc6   :  { %619 = vmatmul.f32.gmra.mxu0 %v2241_v7  ;;  %1232 = vmatpush.msra.mxu1 %v2478_v56 }
  0xc7   :  { %v988_v4 = vsub.f32 %v2496_v24, %v3168_v51  ;;  %978 = vmatpush.msra.mxu3 %v977_v62  ;;  %1118 = vmatpush.msra.mxu0 %v2516_v12  ;;  %v2543_v51 = vsub.f32 %v739_v63, %v2529_v44  ;;  %v994_v32 = vsub.f32 %v2516_v12, %v3180_v19  ;;  %v3169_v23 = vand.u32 4294901760, %v2535_v42 }
  0xc8   :  { %702 = vmatmul.f32.gmra.mxu1 %v2241_v7  ;;  %v738_v7 = vld [vmem:[%s3151_s2] sm:$0xff]  ;;  %781 = vmatpush.msra.mxu2 %v2478_v56 }
  0xc9   :  { %v989_v21 = vand.u32 4294901760, %v988_v4  ;;  %v2546_v62 = vand.u32 4294901760, %v738_v7  ;;  %984 = vmatpush.msra.mxu3 %v983_v14  ;;  %1121 = vmatpush.msra.mxu0 %v2535_v42  ;;  %v3170_v4 = vand.u32 4294901760, %v2543_v51  ;;  %v995_v14 = vand.u32 4294901760, %v994_v32 }
  0xca   :  { %1234 = vmatpush.msra.mxu1 %v2504_v37  ;;  %783 = vmatpush.msra.mxu2 %v2504_v37  ;;  %v1000_v19 = vsub.f32 %v2535_v42, %v3169_v23 }
  0xcb   :  { %v2548_v26 = vpop.f32.mrf.mxu0  ;;  %v2558_v63 = vsub.f32 %v738_v7, %v2546_v62  ;;  %990 = vmatpush.msra.mxu3 %v989_v21  ;;  %1124 = vmatpush.msra.mxu0 %v2543_v51  ;;  %v1006_v15 = vsub.f32 %v2543_v51, %v3170_v4 }
  0xcc   :  { %3179 = vst [vmem:[#allocation13_spill] sm:$0xff] %v2548_v26  ;;  %1236 = vmatpush.msra.mxu1 %v2519_v25  ;;  %v2573_v26 = vpop.f32.mrf.mxu2  ;;  %v1001_v32 = vand.u32 4294901760, %v1000_v19  ;;  %785 = vmatpush.msra.mxu2 %v2519_v25 }
  0xcd   :  { %v2561_v28 = vpop.f32.mrf.mxu1  ;;  %v1011_v7 = vand.u32 4294901760, %v2558_v63  ;;  %996 = vmatpush.msra.mxu3 %v995_v14  ;;  %1127 = vmatpush.msra.mxu0 %v2558_v63  ;;  %v1007_v21 = vand.u32 4294901760, %v1006_v15  ;;  %v3182_v15 = vand.u32 4294901760, %v2295_v39 }
  0xce   :  { %3181 = vst [vmem:[#allocation14_spill] sm:$0xff] %v2561_v28  ;;  %623 = vmatmul.f32.gmra.mxu0 %v2059_v16  ;;  %1238 = vmatpush.msra.mxu1 %v2529_v44  ;;  %v2583_v28 = vpop.f32.mrf.mxu3 }
  0xcf   :  { %v1012_v23 = vsub.f32 %v2558_v63, %v1011_v7  ;;  %1002 = vmatpush.msra.mxu3 %v1001_v32  ;;  %787 = vmatpush.msra.mxu2 %v2529_v44  ;;  %v3184_v32 = vand.u32 4294901760, %v2346_v43 }
  0xd0   :  { %706 = vmatmul.f32.gmra.mxu1 %v2059_v16 }
  0xd1   :  { %v1013_v4 = vand.u32 4294901760, %v1012_v23  ;;  %1008 = vmatpush.msra.mxu3 %v1007_v21  ;;  %1240 = vmatpush.msra.mxu1 %v2546_v62  ;;  %v3183_v23 = vand.u32 4294901760, %v2321_v31  ;;  %v3186_v31 = vand.u32 4294901760, %v2382_v61  ;;  %v3196_v21 = vand.u32 4294901760, %v2543_v51 }
  0xd2   :  { %789 = vmatpush.msra.mxu2 %v2546_v62 }
  0xd3   :  { %v2585_v14 = vpop.f32.mrf.mxu0  ;;  %1014 = vmatpush.msra.mxu3 %v1013_v4  ;;  %v3185_v4 = vand.u32 4294901760, %v2363_v49 }
  0xd4   :  { %1341 = vmatpush.msrb.mxu2 %v3182_v15  ;;  %v2599_v19 = vpop.f32.mrf.mxu2 }
  0xd5   :  { %v2589_v16 = vpop.f32.mrf.mxu1  ;;  %1468 = vmatpush.msrb.mxu3 %v2286_v30  ;;  %v2611_v30 = vld [vmem:[%s3153_s4] ss:$0 sm:$0xff] }
  0xd6   :  { %627 = vmatmul.f32.gmra.mxu0 %v2067_v20  ;;  %1345 = vmatpush.msrb.mxu2 %v3183_v23  ;;  %v123_v43 = vadd.f32 %v2611_v30, %v2257_v9  ;;  %v147_v63 = vadd.f32 %v2611_v30, %v2298_v11 }
  0xd7   :  { %1470 = vmatpush.msrb.mxu3 %v2314_v29 }
  0xd8   :  { %710 = vmatmul.f32.gmra.mxu1 %v2067_v20  ;;  %1349 = vmatpush.msrb.mxu2 %v3184_v32  ;;  %v2614_v20 = vpop.f32.mrf.mxu3 }
  0xd9   :  { %1472 = vmatpush.msrb.mxu3 %v2339_v41  ;;  %v3187_v41 = vand.u32 4294901760, %v2397_v6  ;;  %v274_v6 = vadd.f32 %v2259_v10, %v123_v43  ;;  %v131_v10 = vadd.f32 %v2611_v30, %v2266_v18 }
  0xda   :  { %1353 = vmatpush.msrb.mxu2 %v3185_v4 }
  0xdb   :  { %v2604_v39 = vpop.f32.mrf.mxu0  ;;  %1474 = vmatpush.msrb.mxu3 %v2351_v27  ;;  %v3188_v27 = vand.u32 4294901760, %v2411_v13  ;;  %v3191_v13 = vand.u32 4294901760, %v2461_v8  ;;  %v278_v8 = vadd.f32 %v2268_v34, %v131_v10  ;;  %v139_v34 = vadd.f32 %v2611_v30, %v2275_v52 }
  0xdc   :  { %1357 = vmatpush.msrb.mxu2 %v3186_v31  ;;  %v2631_v49 = vpop.f32.mrf.mxu2 }
  0xdd   :  { %v2616_v29 = vpop.f32.mrf.mxu1  ;;  %1476 = vmatpush.msrb.mxu3 %v2365_v50  ;;  %v3189_v50 = vand.u32 4294901760, %v2433_v2 }
  0xde   :  { %631 = vmatmul.f32.gmra.mxu0 %v2090_v35  ;;  %1361 = vmatpush.msrb.mxu2 %v3187_v41 }
  0xdf   :  { %1478 = vmatpush.msrb.mxu3 %v2384_v45  ;;  %v360_v45 = vadd.f32 %v2499_v54, %v274_v6 }
  0xe0   :  { %714 = vmatmul.f32.gmra.mxu1 %v2090_v35  ;;  %1365 = vmatpush.msrb.mxu2 %v3188_v27  ;;  %v3190_v35 = vand.u32 4294901760, %v2452_v3  ;;  %v3193_v3 = vand.u32 4294901760, %v2496_v24 }
  0xe1   :  { %1480 = vmatpush.msrb.mxu3 %v2399_v58  ;;  %v2646_v58 = vpop.f32.mrf.mxu3  ;;  %v460_v2 = vadd.f32 %v2531_v53, %v360_v45 }
  0xe2   :  { %1369 = vmatpush.msrb.mxu2 %v3189_v50 }
  0xe3   :  { %v2633_v61 = vpop.f32.mrf.mxu0  ;;  %1482 = vmatpush.msrb.mxu3 %v2420_v5  ;;  %v3192_v5 = vand.u32 4294901760, %v2476_v48  ;;  %v365_v48 = vadd.f32 %v2573_v26, %v278_v8 }
  0xe4   :  { %1373 = vmatpush.msrb.mxu2 %v3190_v35  ;;  %v2662_v18 = vpop.f32.mrf.mxu2 }
  0xe5   :  { %v2639_v9 = vpop.f32.mrf.mxu1  ;;  %1484 = vmatpush.msrb.mxu3 %v2436_v40 }
  0xe6   :  { %635 = vmatmul.f32.gmra.mxu0 %v2124_v55  ;;  %1377 = vmatpush.msrb.mxu2 %v3191_v13 }
  0xe7   :  { %1486 = vmatpush.msrb.mxu3 %v2446_v57  ;;  %v3194_v57 = vand.u32 4294901760, %v2516_v12  ;;  %v466_v12 = vadd.f32 %v2583_v28, %v365_v48 }
  0xe8   :  { %718 = vmatmul.f32.gmra.mxu1 %v2124_v55  ;;  %1381 = vmatpush.msrb.mxu2 %v3192_v5 }
  0xe9   :  { %1488 = vmatpush.msrb.mxu3 %v2463_v47  ;;  %v3195_v47 = vand.u32 4294901760, %v2535_v42  ;;  %v282_v42 = vadd.f32 %v2279_v0, %v139_v34 }
  0xea   :  { %1385 = vmatpush.msrb.mxu2 %v3193_v3 }
  0xeb   :  { %v576_v40 = vpop.f32.mrf.mxu0  ;;  %1490 = vmatpush.msrb.mxu3 %v2478_v56  ;;  %v483_v56 = vpop.f32.mrf.mxu3  ;;  %v370_v28 = vadd.f32 %v2599_v19, %v282_v42 }
  0xec   :  { %v577_v54 = vadd.f32 %v576_v40, %v460_v2  ;;  %1389 = vmatpush.msrb.mxu2 %v3194_v57 }
  0xed   :  { %v659_v55 = vpop.f32.mrf.mxu1  ;;  %1492 = vmatpush.msrb.mxu3 %v2504_v37  ;;  %v472_v32 = vadd.f32 %v2614_v20, %v370_v28  ;;  %v155_v20 = vadd.f32 %v2611_v30, %v2326_v36 }
  0xee   :  { %v660_v53 = vadd.f32 %v659_v55, %v577_v54  ;;  %1393 = vmatpush.msrb.mxu2 %v3195_v47 }
  0xef   :  { %1494 = vmatpush.msrb.mxu3 %v2519_v25  ;;  %v290_v3 = vadd.f32 %v2330_v38, %v155_v20 }
  0xf0   :  { %v722_v24 = vmax.f32 %v660_v53, 0.0  ;;  %1397 = vmatpush.msrb.mxu2 %v3196_v21 }
  0xf1   :  { %1496 = vmatpush.msrb.mxu3 %v2529_v44  ;;  %v384_v44 = vpop.f32.mrf.mxu2  ;;  %v380_v55 = vadd.f32 %v2662_v18, %v290_v3 }
  0xf2   :  { %v2676_v15 = vand.u32 4294901760, %v722_v24  ;;  %1401 = vmatpush.msrb.mxu2 %v1011_v7 }
  0xf3   :  { %v580_v37 = vpop.f32.mrf.mxu0  ;;  %1498 = vmatpush.msrb.mxu3 %v2546_v62  ;;  %v489_v41 = vpop.f32.mrf.mxu3  ;;  %v286_v62 = vadd.f32 %v2302_v22, %v147_v63  ;;  %v484_v38 = vadd.f32 %v483_v56, %v380_v55  ;;  %v171_v56 = vadd.f32 %v2611_v30, %v2417_v17 }
  0xf4   :  { %v791_v52 = vsub.f32 %v722_v24, %v2676_v15  ;;  %v581_v26 = vadd.f32 %v580_v37, %v466_v12  ;;  %1016 = vmatmul.f32.vlgmr.msra.gmra.mxu3 %v2676_v15 }
  0xf5   :  { %v663_v25 = vpop.f32.mrf.mxu1  ;;  %v375_v11 = vadd.f32 %v2631_v49, %v286_v62 }
  0xf6   :  { %v792_v51 = vand.u32 4294901760, %v791_v52  ;;  %v664_v23 = vadd.f32 %v663_v25, %v581_v26  ;;  %1130 = vmatmul.f32.vlgmr.msra.gmra.mxu0 %v791_v52 }
  0xf7   :  { %v478_v22 = vadd.f32 %v2646_v58, %v375_v11  ;;  %v163_v58 = vadd.f32 %v2611_v30, %v2354_v46 }
  0xf8   :  { %v723_v7 = vmax.f32 %v664_v23, 0.0  ;;  %1244 = vmatmul.f32.vlgmr.msra.gmra.mxu1 %v792_v51  ;;  %v793_v0 = vsub.f32 %v791_v52, %v792_v51 }
  0xf9   :  { %v389_v10 = vpop.f32.mrf.mxu2  ;;  %v294_v37 = vadd.f32 %v2370_v33, %v163_v58 }
  0xfa   :  { %v2689_v4 = vand.u32 4294901760, %v723_v7  ;;  %v794_v31 = vand.u32 4294901760, %v793_v0 }
  0xfb   :  { %v584_v43 = vpop.f32.mrf.mxu0  ;;  %v495_v54 = vpop.f32.mrf.mxu3  ;;  %v385_v26 = vadd.f32 %v384_v44, %v294_v37 }
  0xfc   :  { %v585_v19 = vadd.f32 %v584_v43, %v472_v32  ;;  %795 = vmatmul.f32.vlgmr.msra.gmra.mxu2 %v794_v31  ;;  %1020 = vmatmul.f32.gmra.mxu3 %v2689_v4  ;;  %v799_v27 = vsub.f32 %v723_v7, %v2689_v4  ;;  %v298_v32 = vadd.f32 %v2430_v60, %v171_v56 }
  0xfd   :  { %v667_v50 = vpop.f32.mrf.mxu1  ;;  %v490_v63 = vadd.f32 %v489_v41, %v385_v26  ;;  %v179_v41 = vadd.f32 %v2611_v30, %v2481_v1 }
  0xfe   :  { %v668_v6 = vadd.f32 %v667_v50, %v585_v19  ;;  %1135 = vmatmul.f32.gmra.mxu0 %v799_v27  ;;  %v800_v35 = vand.u32 4294901760, %v799_v27  ;;  %v390_v19 = vadd.f32 %v389_v10, %v298_v32 }
 0x100   :  { %v724_v45 = vmax.f32 %v668_v6, 0.0  ;;  %1250 = vmatmul.f32.gmra.mxu1 %v800_v35  ;;  %v801_v13 = vsub.f32 %v799_v27, %v800_v35  ;;  %v496_v60 = vadd.f32 %v495_v54, %v390_v19 }
 0x101   :  { %v394_v21 = vpop.f32.mrf.mxu2 }
 0x102   :  { %v2698_v5 = vand.u32 4294901760, %v724_v45  ;;  %v802_v2 = vand.u32 4294901760, %v801_v13  ;;  %v302_v13 = vadd.f32 %v2501_v59, %v179_v41 }
 0x103   :  { %v588_v40 = vpop.f32.mrf.mxu0  ;;  %v501_v28 = vpop.f32.mrf.mxu3 }
 0x104   :  { %v589_v8 = vadd.f32 %v588_v40, %v478_v22  ;;  %803 = vmatmul.f32.gmra.mxu2 %v802_v2  ;;  %1024 = vmatmul.f32.gmra.mxu3 %v2698_v5  ;;  %v807_v49 = vsub.f32 %v724_v45, %v2698_v5  ;;  %v395_v40 = vadd.f32 %v394_v21, %v302_v13 }
 0x105   :  { %v671_v36 = vpop.f32.mrf.mxu1 }
 0x106   :  { %v672_v57 = vadd.f32 %v671_v36, %v589_v8  ;;  %1140 = vmatmul.f32.gmra.mxu0 %v807_v49  ;;  %v808_v48 = vand.u32 4294901760, %v807_v49 }
 0x108   :  { %v725_v53 = vmax.f32 %v672_v57, 0.0  ;;  %1256 = vmatmul.f32.gmra.mxu1 %v808_v48  ;;  %v809_v47 = vsub.f32 %v807_v49, %v808_v48  ;;  %v3197_v49 = vld [vmem:[#allocation13_spill] sm:$0xff]  ;;  %v502_v57 = vadd.f32 %v501_v28, %v395_v40 }
 0x109   :  { %v399_v43 = vpop.f32.mrf.mxu2  ;;  %v187_v54 = vadd.f32 %v2611_v30, %v3197_v49 }
 0x10a   :  { %v2706_v34 = vand.u32 4294901760, %v725_v53  ;;  %v810_v24 = vand.u32 4294901760, %v809_v47  ;;  %v3198_v47 = vld [vmem:[#allocation14_spill] sm:$0xff] }
 0x10b   :  { %v592_v12 = vpop.f32.mrf.mxu0  ;;  %v507_v6 = vpop.f32.mrf.mxu3 }
 0x10c   :  { %v593_v42 = vadd.f32 %v592_v12, %v484_v38  ;;  %811 = vmatmul.f32.gmra.mxu2 %v810_v24  ;;  %1028 = vmatmul.f32.gmra.mxu3 %v2706_v34  ;;  %v815_v18 = vsub.f32 %v725_v53, %v2706_v34  ;;  %v306_v38 = vadd.f32 %v3198_v47, %v187_v54  ;;  %v3199_v47 = vld [vmem:[#allocation5_spill] sm:$0xff] }
 0x10d   :  { %v675_v52 = vpop.f32.mrf.mxu1 }
 0x10e   :  { %v676_v46 = vadd.f32 %v675_v52, %v593_v42  ;;  %1145 = vmatmul.f32.gmra.mxu0 %v815_v18  ;;  %v816_v25 = vand.u32 4294901760, %v815_v18  ;;  %v400_v37 = vadd.f32 %v399_v43, %v306_v38  ;;  %v195_v52 = vadd.f32 %v2611_v30, %v2585_v14 }
 0x10f   :  { %v219_v38 = vadd.f32 %v2611_v30, %v3199_v47  ;;  %v3205_v47 = vld [vmem:[#allocation11_spill] sm:$0xff] }
 0x110   :  { %v726_v51 = vmax.f32 %v676_v46, 0.0  ;;  %1262 = vmatmul.f32.gmra.mxu1 %v816_v25  ;;  %v817_v23 = vsub.f32 %v815_v18, %v816_v25  ;;  %v508_v28 = vadd.f32 %v507_v6, %v400_v37 }
 0x111   :  { %v404_v8 = vpop.f32.mrf.mxu2 }
 0x112   :  { %v2713_v33 = vand.u32 4294901760, %v726_v51  ;;  %v818_v7 = vand.u32 4294901760, %v817_v23 }
 0x113   :  { %v596_v0 = vpop.f32.mrf.mxu0  ;;  %v513_v58 = vpop.f32.mrf.mxu3 }
 0x114   :  { %v597_v31 = vadd.f32 %v596_v0, %v490_v63  ;;  %819 = vmatmul.f32.gmra.mxu2 %v818_v7  ;;  %1032 = vmatmul.f32.gmra.mxu3 %v2713_v33  ;;  %v823_v44 = vsub.f32 %v726_v51, %v2713_v33  ;;  %v310_v63 = vadd.f32 %v2589_v16, %v195_v52  ;;  %v3200_v52 = vld [vmem:[#allocation6_spill] sm:$0xff] }
 0x115   :  { %v679_v62 = vpop.f32.mrf.mxu1 }
 0x116   :  { %v680_v17 = vadd.f32 %v679_v62, %v597_v31  ;;  %1150 = vmatmul.f32.gmra.mxu0 %v823_v44  ;;  %v824_v27 = vand.u32 4294901760, %v823_v44  ;;  %v405_v14 = vadd.f32 %v404_v8, %v310_v63  ;;  %v203_v62 = vadd.f32 %v2611_v30, %v2604_v39 }
 0x118   :  { %v727_v50 = vmax.f32 %v680_v17, 0.0  ;;  %1268 = vmatmul.f32.gmra.mxu1 %v824_v27  ;;  %v825_v11 = vsub.f32 %v823_v44, %v824_v27  ;;  %v514_v27 = vadd.f32 %v513_v58, %v405_v14  ;;  %v314_v6 = vadd.f32 %v2616_v29, %v203_v62 }
 0x119   :  { %v409_v25 = vpop.f32.mrf.mxu2 }
 0x11a   :  { %v2720_v35 = vand.u32 4294901760, %v727_v50  ;;  %v826_v20 = vand.u32 4294901760, %v825_v11  ;;  %v410_v13 = vadd.f32 %v409_v25, %v314_v6 }
 0x11b   :  { %v600_v45 = vpop.f32.mrf.mxu0  ;;  %v519_v32 = vpop.f32.mrf.mxu3 }
 0x11c   :  { %v601_v22 = vadd.f32 %v600_v45, %v496_v60  ;;  %827 = vmatmul.f32.gmra.mxu2 %v826_v20  ;;  %1036 = vmatmul.f32.gmra.mxu3 %v2720_v35  ;;  %v831_v10 = vsub.f32 %v727_v50, %v2720_v35 }
 0x11d   :  { %v683_v2 = vpop.f32.mrf.mxu1 }
 0x11e   :  { %v684_v1 = vadd.f32 %v683_v2, %v601_v22  ;;  %1155 = vmatmul.f32.gmra.mxu0 %v831_v10  ;;  %v832_v3 = vand.u32 4294901760, %v831_v10  ;;  %v211_v2 = vadd.f32 %v2611_v30, %v2633_v61 }
 0x120   :  { %v728_v36 = vmax.f32 %v684_v1, 0.0  ;;  %1274 = vmatmul.f32.gmra.mxu1 %v832_v3  ;;  %v833_v55 = vsub.f32 %v831_v10, %v832_v3  ;;  %v520_v3 = vadd.f32 %v519_v32, %v410_v13  ;;  %v318_v54 = vadd.f32 %v2639_v9, %v211_v2  ;;  %v3203_v13 = vld [vmem:[#allocation9_spill] sm:$0xff] }
 0x121   :  { %v414_v50 = vpop.f32.mrf.mxu2 }
 0x122   :  { %v2727_v59 = vand.u32 4294901760, %v728_v36  ;;  %v834_v48 = vand.u32 4294901760, %v833_v55  ;;  %v415_v58 = vadd.f32 %v414_v50, %v318_v54 }
 0x123   :  { %v604_v53 = vpop.f32.mrf.mxu0  ;;  %v525_v10 = vpop.f32.mrf.mxu3 }
 0x124   :  { %v605_v24 = vadd.f32 %v604_v53, %v502_v57  ;;  %835 = vmatmul.f32.gmra.mxu2 %v834_v48  ;;  %1040 = vmatmul.f32.gmra.mxu3 %v2727_v59  ;;  %v839_v21 = vsub.f32 %v728_v36, %v2727_v59  ;;  %v526_v9 = vadd.f32 %v525_v10, %v415_v58 }
 0x125   :  { %v687_v12 = vpop.f32.mrf.mxu1 }
 0x126   :  { %v688_v42 = vadd.f32 %v687_v12, %v605_v24  ;;  %1160 = vmatmul.f32.gmra.mxu0 %v839_v21  ;;  %v840_v18 = vand.u32 4294901760, %v839_v21 }
 0x128   :  { %v729_v26 = vmax.f32 %v688_v42, 0.0  ;;  %1280 = vmatmul.f32.gmra.mxu1 %v840_v18  ;;  %v841_v46 = vsub.f32 %v839_v21, %v840_v18 }
 0x129   :  { %v419_v57 = vpop.f32.mrf.mxu2 }
 0x12a   :  { %v2734_v56 = vand.u32 4294901760, %v729_v26  ;;  %v842_v51 = vand.u32 4294901760, %v841_v46 }
 0x12b   :  { %v608_v23 = vpop.f32.mrf.mxu0  ;;  %v531_v12 = vpop.f32.mrf.mxu3 }
 0x12c   :  { %v609_v7 = vadd.f32 %v608_v23, %v508_v28  ;;  %843 = vmatmul.f32.gmra.mxu2 %v842_v51  ;;  %1044 = vmatmul.f32.gmra.mxu3 %v2734_v56  ;;  %v847_v0 = vsub.f32 %v729_v26, %v2734_v56  ;;  %v322_v26 = vadd.f32 %v3200_v52, %v219_v38 }
 0x12d   :  { %v691_v31 = vpop.f32.mrf.mxu1  ;;  %v243_v38 = vadd.f32 %v2611_v30, %v3205_v47 }
 0x12e   :  { %v692_v44 = vadd.f32 %v691_v31, %v609_v7  ;;  %1165 = vmatmul.f32.gmra.mxu0 %v847_v0  ;;  %v848_v43 = vand.u32 4294901760, %v847_v0  ;;  %v420_v51 = vadd.f32 %v419_v57, %v322_v26  ;;  %v3206_v26 = vld [vmem:[#allocation12_spill] sm:$0xff] }
 0x130   :  { %v730_v19 = vmax.f32 %v692_v44, 0.0  ;;  %1286 = vmatmul.f32.gmra.mxu1 %v848_v43  ;;  %v849_v17 = vsub.f32 %v847_v0, %v848_v43  ;;  %v3201_v0 = vld [vmem:[#allocation7_spill] sm:$0xff]  ;;  %v532_v44 = vadd.f32 %v531_v12, %v420_v51 }
 0x131   :  { %v424_v7 = vpop.f32.mrf.mxu2  ;;  %v227_v32 = vadd.f32 %v2611_v30, %v3201_v0 }
 0x132   :  { %v2741_v16 = vand.u32 4294901760, %v730_v19  ;;  %v850_v41 = vand.u32 4294901760, %v849_v17 }
 0x133   :  { %v612_v11 = vpop.f32.mrf.mxu0 }
 0x134   :  { %v613_v60 = vadd.f32 %v612_v11, %v514_v27  ;;  %851 = vmatmul.f32.gmra.mxu2 %v850_v41  ;;  %1048 = vmatmul.f32.gmra.mxu3 %v2741_v16  ;;  %v855_v20 = vsub.f32 %v730_v19, %v2741_v16  ;;  %v537_v19 = vpop.f32.mrf.mxu3  ;;  %v3202_v27 = vld [vmem:[#allocation8_spill] sm:$0xff] }
 0x135   :  { %v695_v45 = vpop.f32.mrf.mxu1  ;;  %v326_v41 = vadd.f32 %v3202_v27, %v227_v32 }
 0x136   :  { %v696_v39 = vadd.f32 %v695_v45, %v613_v60  ;;  %1170 = vmatmul.f32.gmra.mxu0 %v855_v20  ;;  %v856_v22 = vand.u32 4294901760, %v855_v20 }
 0x137   :  { %v425_v60 = vadd.f32 %v424_v7, %v326_v41 }
 0x138   :  { %v731_v40 = vmax.f32 %v696_v39, 0.0  ;;  %1292 = vmatmul.f32.gmra.mxu1 %v856_v22  ;;  %v857_v1 = vsub.f32 %v855_v20, %v856_v22  ;;  %v235_v39 = vadd.f32 %v2611_v30, %v3203_v13 }
 0x139   :  { %v429_v2 = vpop.f32.mrf.mxu2 }
 0x13a   :  { %v2748_v29 = vand.u32 4294901760, %v731_v40  ;;  %v858_v8 = vand.u32 4294901760, %v857_v1 }
 0x13b   :  { %v616_v49 = vpop.f32.mrf.mxu0 }
 0x13c   :  { %v617_v36 = vadd.f32 %v616_v49, %v520_v3  ;;  %859 = vmatmul.f32.gmra.mxu2 %v858_v8  ;;  %1052 = vmatmul.f32.gmra.mxu3 %v2748_v29  ;;  %v863_v55 = vsub.f32 %v731_v40, %v2748_v29  ;;  %v538_v40 = vadd.f32 %v537_v19, %v425_v60  ;;  %v3204_v49 = vld [vmem:[#allocation10_spill] sm:$0xff]  ;;  %v543_v57 = vpop.f32.mrf.mxu3 }
 0x13d   :  { %v699_v48 = vpop.f32.mrf.mxu1  ;;  %v330_v54 = vadd.f32 %v3204_v49, %v235_v39 }
 0x13e   :  { %v700_v61 = vadd.f32 %v699_v48, %v617_v36  ;;  %1175 = vmatmul.f32.gmra.mxu0 %v863_v55  ;;  %v864_v53 = vand.u32 4294901760, %v863_v55 }
 0x13f   :  { %v430_v58 = vadd.f32 %v429_v2, %v330_v54 }
 0x140   :  { %v732_v24 = vmax.f32 %v700_v61, 0.0  ;;  %1298 = vmatmul.f32.gmra.mxu1 %v864_v53  ;;  %v865_v21 = vsub.f32 %v863_v55, %v864_v53 }
 0x141   :  { %v544_v12 = vadd.f32 %v543_v57, %v430_v58 }
 0x142   :  { %v2755_v37 = vand.u32 4294901760, %v732_v24  ;;  %v866_v42 = vand.u32 4294901760, %v865_v21 }
 0x143   :  { %v620_v18 = vpop.f32.mrf.mxu0 }
 0x144   :  { %v871_v46 = vsub.f32 %v732_v24, %v2755_v37  ;;  %v621_v25 = vadd.f32 %v620_v18, %v526_v9  ;;  %867 = vmatmul.f32.gmra.mxu2 %v866_v42  ;;  %1056 = vmatmul.f32.gmra.mxu3 %v2755_v37  ;;  %v434_v18 = vpop.f32.mrf.mxu2  ;;  %v549_v7 = vpop.f32.mrf.mxu3 }
 0x145   :  { %v703_v28 = vpop.f32.mrf.mxu1 }
 0x146   :  { %v704_v23 = vadd.f32 %v703_v28, %v621_v25  ;;  %1180 = vmatmul.f32.gmra.mxu0 %v871_v46  ;;  %v872_v63 = vand.u32 4294901760, %v871_v46 }
 0x148   :  { %v733_v31 = vmax.f32 %v704_v23, 0.0  ;;  %1304 = vmatmul.f32.gmra.mxu1 %v872_v63  ;;  %v873_v14 = vsub.f32 %v871_v46, %v872_v63  ;;  %v334_v46 = vadd.f32 %v3206_v26, %v243_v38 }
 0x14a   :  { %v2762_v43 = vand.u32 4294901760, %v733_v31  ;;  %v874_v62 = vand.u32 4294901760, %v873_v14  ;;  %v435_v23 = vadd.f32 %v434_v18, %v334_v46 }
 0x14b   :  { %v624_v17 = vpop.f32.mrf.mxu0 }
 0x14c   :  { %v879_v50 = vsub.f32 %v733_v31, %v2762_v43  ;;  %v625_v11 = vadd.f32 %v624_v17, %v532_v44  ;;  %875 = vmatmul.f32.gmra.mxu2 %v874_v62  ;;  %1060 = vmatmul.f32.gmra.mxu3 %v2762_v43  ;;  %v550_v31 = vadd.f32 %v549_v7, %v435_v23 }
 0x14d   :  { %v707_v6 = vpop.f32.mrf.mxu1 }
 0x14e   :  { %v708_v20 = vadd.f32 %v707_v6, %v625_v11  ;;  %1185 = vmatmul.f32.gmra.mxu0 %v879_v50  ;;  %v880_v45 = vand.u32 4294901760, %v879_v50 }
 0x150   :  { %v734_v22 = vmax.f32 %v708_v20, 0.0  ;;  %1310 = vmatmul.f32.gmra.mxu1 %v880_v45  ;;  %v881_v10 = vsub.f32 %v879_v50, %v880_v45 }
 0x152   :  { %v2769_v1 = vand.u32 4294901760, %v734_v22  ;;  %v882_v3 = vand.u32 4294901760, %v881_v10 }
 0x153   :  { %v628_v8 = vpop.f32.mrf.mxu0 }
 0x154   :  { %v887_v36 = vsub.f32 %v734_v22, %v2769_v1  ;;  %v629_v55 = vadd.f32 %v628_v8, %v538_v40  ;;  %883 = vmatmul.f32.gmra.mxu2 %v882_v3  ;;  %1064 = vmatmul.f32.gmra.mxu3 %v2769_v1  ;;  %v2795_v8 = vld [vmem:[%s3154_s5] ss:$0 sm:$0xff] }
 0x155   :  { %v711_v48 = vpop.f32.mrf.mxu1 }
 0x156   :  { %v712_v61 = vadd.f32 %v711_v48, %v629_v55  ;;  %1190 = vmatmul.f32.gmra.mxu0 %v887_v36  ;;  %v888_v53 = vand.u32 4294901760, %v887_v36 }
 0x158   :  { %v735_v24 = vmax.f32 %v712_v61, 0.0  ;;  %1316 = vmatmul.f32.gmra.mxu1 %v888_v53  ;;  %v889_v21 = vsub.f32 %v887_v36, %v888_v53 }
 0x15a   :  { %v2776_v9 = vand.u32 4294901760, %v735_v24  ;;  %v890_v42 = vand.u32 4294901760, %v889_v21 }
 0x15b   :  { %v632_v52 = vpop.f32.mrf.mxu0 }
 0x15c   :  { %v895_v25 = vsub.f32 %v735_v24, %v2776_v9  ;;  %v633_v28 = vadd.f32 %v632_v52, %v544_v12  ;;  %891 = vmatmul.f32.gmra.mxu2 %v890_v42  ;;  %1068 = vmatmul.f32.gmra.mxu3 %v2776_v9 }
 0x15d   :  { %v715_v51 = vpop.f32.mrf.mxu1 }
 0x15e   :  { %v716_v30 = vadd.f32 %v715_v51, %v633_v28  ;;  %1195 = vmatmul.f32.gmra.mxu0 %v895_v25  ;;  %v896_v63 = vand.u32 4294901760, %v895_v25 }
 0x160   :  { %v736_v0 = vmax.f32 %v716_v30, 0.0  ;;  %1322 = vmatmul.f32.gmra.mxu1 %v896_v63  ;;  %v897_v32 = vsub.f32 %v895_v25, %v896_v63 }
 0x162   :  { %v2781_v14 = vand.u32 4294901760, %v736_v0  ;;  %v898_v44 = vand.u32 4294901760, %v897_v32 }
 0x163   :  { %v636_v62 = vpop.f32.mrf.mxu0 }
 0x164   :  { %v903_v19 = vsub.f32 %v736_v0, %v2781_v14  ;;  %v637_v17 = vadd.f32 %v636_v62, %v550_v31  ;;  %899 = vmatmul.f32.gmra.mxu2 %v898_v44  ;;  %1072 = vmatmul.f32.gmra.mxu3 %v2781_v14 }
 0x165   :  { %v719_v27 = vpop.f32.mrf.mxu1 }
 0x166   :  { %v720_v41 = vadd.f32 %v719_v27, %v637_v17  ;;  %1200 = vmatmul.f32.gmra.mxu0 %v903_v19  ;;  %v904_v50 = vand.u32 4294901760, %v903_v19 }
 0x168   :  { %v737_v11 = vmax.f32 %v720_v41, 0.0  ;;  %1328 = vmatmul.f32.gmra.mxu1 %v904_v50  ;;  %v905_v6 = vsub.f32 %v903_v19, %v904_v50 }
 0x16a   :  { %v2785_v60 = vand.u32 4294901760, %v737_v11  ;;  %v906_v20 = vand.u32 4294901760, %v905_v6 }
 0x16c   :  { %v911_v45 = vsub.f32 %v737_v11, %v2785_v60  ;;  %907 = vmatmul.f32.gmra.mxu2 %v906_v20  ;;  %1076 = vmatmul.f32.gmra.mxu3 %v2785_v60 }
 0x16e   :  { %1205 = vmatmul.f32.gmra.mxu0 %v911_v45  ;;  %v912_v13 = vand.u32 4294901760, %v911_v45 }
 0x170   :  { %1334 = vmatmul.f32.gmra.mxu1 %v912_v13  ;;  %v913_v39 = vsub.f32 %v911_v45, %v912_v13 }
 0x172   :  { %v914_v22 = vand.u32 4294901760, %v913_v39 }
 0x173   :  { %v1131_v10 = vpop.f32.mrf.mxu0 }
 0x174   :  { %915 = vmatmul.f32.gmra.mxu2 %v914_v22  ;;  %1500 = vmatmul.f32.vlgmr.msrb.gmra.mxu3 %v2676_v15 }
 0x175   :  { %v1245_v2 = vpop.f32.mrf.mxu1 }
 0x177   :  { %v1017_v40 = vpop.f32.mrf.mxu3 }
 0x17b   :  { %v1136_v3 = vpop.f32.mrf.mxu0 }
 0x17c   :  { %1403 = vmatmul.f32.vlgmr.msrb.gmra.mxu2 %v2676_v15  ;;  %1504 = vmatmul.f32.gmra.mxu3 %v2689_v4 }
 0x17d   :  { %v1251_v49 = vpop.f32.mrf.mxu1 }
 0x17f   :  { %v796_v54 = vpop.f32.mrf.mxu2  ;;  %v1021_v36 = vpop.f32.mrf.mxu3 }
 0x180   :  { %v797_v55 = vadd.f32 %v2795_v8, %v796_v54 }
 0x182   :  { %v1018_v57 = vadd.f32 %v1017_v40, %v797_v55 }
 0x183   :  { %v1141_v48 = vpop.f32.mrf.mxu0 }
 0x184   :  { %1407 = vmatmul.f32.gmra.mxu2 %v2689_v4  ;;  %1508 = vmatmul.f32.gmra.mxu3 %v2698_v5  ;;  %v1132_v58 = vadd.f32 %v1131_v10, %v1018_v57 }
 0x185   :  { %v1257_v15 = vpop.f32.mrf.mxu1 }
 0x186   :  { %v2800_v61 = vadd.f32 %v1245_v2, %v1132_v58 }
 0x187   :  { %v804_v53 = vpop.f32.mrf.mxu2  ;;  %v1025_v47 = vpop.f32.mrf.mxu3 }
 0x188   :  { %v805_v38 = vadd.f32 %v2795_v8, %v804_v53 }
 0x18a   :  { %v1022_v24 = vadd.f32 %v1021_v36, %v805_v38 }
 0x18b   :  { %v1146_v12 = vpop.f32.mrf.mxu0 }
 0x18c   :  { %1411 = vmatmul.f32.gmra.mxu2 %v2698_v5  ;;  %1512 = vmatmul.f32.gmra.mxu3 %v2706_v34  ;;  %v1137_v21 = vadd.f32 %v1136_v3, %v1022_v24 }
 0x18d   :  { %v1263_v52 = vpop.f32.mrf.mxu1 }
 0x18e   :  { %v2805_v42 = vadd.f32 %v1251_v49, %v1137_v21 }
 0x18f   :  { %v812_v4 = vpop.f32.mrf.mxu2  ;;  %v1029_v18 = vpop.f32.mrf.mxu3 }
 0x190   :  { %v813_v26 = vadd.f32 %v2795_v8, %v812_v4 }
 0x192   :  { %v1026_v46 = vadd.f32 %v1025_v47, %v813_v26 }
 0x193   :  { %v1151_v23 = vpop.f32.mrf.mxu0 }
 0x194   :  { %1415 = vmatmul.f32.gmra.mxu2 %v2706_v34  ;;  %1516 = vmatmul.f32.gmra.mxu3 %v2713_v33  ;;  %v1142_v25 = vadd.f32 %v1141_v48, %v1026_v46 }
 0x195   :  { %v1269_v63 = vpop.f32.mrf.mxu1 }
 0x196   :  { %v2810_v28 = vadd.f32 %v1257_v15, %v1142_v25 }
 0x197   :  { %v820_v5 = vpop.f32.mrf.mxu2  ;;  %v1033_v51 = vpop.f32.mrf.mxu3 }
 0x198   :  { %v821_v30 = vadd.f32 %v2795_v8, %v820_v5 }
 0x19a   :  { %v1030_v7 = vadd.f32 %v1029_v18, %v821_v30 }
 0x19b   :  { %v1156_v62 = vpop.f32.mrf.mxu0 }
 0x19c   :  { %1419 = vmatmul.f32.gmra.mxu2 %v2713_v33  ;;  %1520 = vmatmul.f32.gmra.mxu3 %v2720_v35  ;;  %v1147_v0 = vadd.f32 %v1146_v12, %v1030_v7 }
 0x19d   :  { %v1275_v17 = vpop.f32.mrf.mxu1 }
 0x19e   :  { %v2815_v32 = vadd.f32 %v1263_v52, %v1147_v0 }
 0x19f   :  { %v828_v34 = vpop.f32.mrf.mxu2  ;;  %v1037_v31 = vpop.f32.mrf.mxu3 }
 0x1a0   :  { %v829_v44 = vadd.f32 %v2795_v8, %v828_v34 }
 0x1a2   :  { %v1034_v19 = vadd.f32 %v1033_v51, %v829_v44 }
 0x1a3   :  { %v1161_v20 = vpop.f32.mrf.mxu0 }
 0x1a4   :  { %1423 = vmatmul.f32.gmra.mxu2 %v2720_v35  ;;  %1524 = vmatmul.f32.gmra.mxu3 %v2727_v59  ;;  %v1152_v27 = vadd.f32 %v1151_v23, %v1034_v19 }
 0x1a5   :  { %v1281_v13 = vpop.f32.mrf.mxu1 }
 0x1a6   :  { %v2820_v41 = vadd.f32 %v1269_v63, %v1152_v27 }
 0x1a7   :  { %v836_v33 = vpop.f32.mrf.mxu2  ;;  %v1041_v50 = vpop.f32.mrf.mxu3 }
 0x1a8   :  { %v837_v11 = vadd.f32 %v2795_v8, %v836_v33 }
 0x1aa   :  { %v1038_v6 = vadd.f32 %v1037_v31, %v837_v11 }
 0x1ab   :  { %v1166_v3 = vpop.f32.mrf.mxu0 }
 0x1ac   :  { %1427 = vmatmul.f32.gmra.mxu2 %v2727_v59  ;;  %1528 = vmatmul.f32.gmra.mxu3 %v2734_v56  ;;  %v1157_v45 = vadd.f32 %v1156_v62, %v1038_v6 }
 0x1ad   :  { %v1287_v55 = vpop.f32.mrf.mxu1 }
 0x1ae   :  { %v2825_v39 = vadd.f32 %v1275_v17, %v1157_v45 }
 0x1af   :  { %v844_v35 = vpop.f32.mrf.mxu2  ;;  %v1045_v22 = vpop.f32.mrf.mxu3 }
 0x1b0   :  { %v845_v10 = vadd.f32 %v2795_v8, %v844_v35 }
 0x1b2   :  { %v1042_v2 = vadd.f32 %v1041_v50, %v845_v10 }
 0x1b3   :  { %v1171_v47 = vpop.f32.mrf.mxu0 }
 0x1b4   :  { %1431 = vmatmul.f32.gmra.mxu2 %v2734_v56  ;;  %1532 = vmatmul.f32.gmra.mxu3 %v2741_v16  ;;  %v1162_v40 = vadd.f32 %v1161_v20, %v1042_v2 }
 0x1b5   :  { %v1293_v24 = vpop.f32.mrf.mxu1 }
 0x1b6   :  { %v2830_v49 = vadd.f32 %v1281_v13, %v1162_v40 }
 0x1b7   :  { %v852_v59 = vpop.f32.mrf.mxu2  ;;  %v1049_v54 = vpop.f32.mrf.mxu3 }
 0x1b8   :  { %v853_v36 = vadd.f32 %v2795_v8, %v852_v59 }
 0x1ba   :  { %v1046_v57 = vadd.f32 %v1045_v22, %v853_v36 }
 0x1bb   :  { %v1176_v26 = vpop.f32.mrf.mxu0 }
 0x1bc   :  { %1435 = vmatmul.f32.gmra.mxu2 %v2741_v16  ;;  %1536 = vmatmul.f32.gmra.mxu3 %v2748_v29  ;;  %v1167_v48 = vadd.f32 %v1166_v3, %v1046_v57 }
 0x1bd   :  { %v1299_v25 = vpop.f32.mrf.mxu1 }
 0x1be   :  { %v2835_v58 = vadd.f32 %v1287_v55, %v1167_v48 }
 0x1bf   :  { %v860_v56 = vpop.f32.mrf.mxu2  ;;  %v1053_v15 = vpop.f32.mrf.mxu3 }
 0x1c0   :  { %v861_v53 = vadd.f32 %v2795_v8, %v860_v56 }
 0x1c2   :  { %v1050_v38 = vadd.f32 %v1049_v54, %v861_v53 }
 0x1c4   :  { %1439 = vmatmul.f32.gmra.mxu2 %v2748_v29  ;;  %1540 = vmatmul.f32.gmra.mxu3 %v2755_v37  ;;  %v1172_v21 = vadd.f32 %v1171_v47, %v1050_v38 }
 0x1c6   :  { %v2840_v12 = vadd.f32 %v1293_v24, %v1172_v21 }
 0x1c7   :  { %v868_v16 = vpop.f32.mrf.mxu2  ;;  %v1057_v4 = vpop.f32.mrf.mxu3 }
 0x1c8   :  { %v869_v18 = vadd.f32 %v2795_v8, %v868_v16 }
 0x1ca   :  { %v1054_v52 = vadd.f32 %v1053_v15, %v869_v18 }
 0x1cc   :  { %1443 = vmatmul.f32.gmra.mxu2 %v2755_v37  ;;  %1544 = vmatmul.f32.gmra.mxu3 %v2762_v43  ;;  %v1177_v46 = vadd.f32 %v1176_v26, %v1054_v52 }
 0x1ce   :  { %v2845_v5 = vadd.f32 %v1299_v25, %v1177_v46 }
 0x1cf   :  { %v876_v29 = vpop.f32.mrf.mxu2  ;;  %v1061_v51 = vpop.f32.mrf.mxu3 }
 0x1d0   :  { %v877_v23 = vadd.f32 %v2795_v8, %v876_v29 }
 0x1d2   :  { %v2848_v30 = vadd.f32 %v1057_v4, %v877_v23 }
 0x1d4   :  { %1447 = vmatmul.f32.gmra.mxu2 %v2762_v43  ;;  %1548 = vmatmul.f32.gmra.mxu3 %v2769_v1 }
 0x1d7   :  { %v884_v63 = vpop.f32.mrf.mxu2  ;;  %v1065_v7 = vpop.f32.mrf.mxu3 }
 0x1d8   :  { %v885_v37 = vadd.f32 %v2795_v8, %v884_v63 }
 0x1da   :  { %v2853_v0 = vadd.f32 %v1061_v51, %v885_v37  ;;  %v1305_v51 = vpop.f32.mrf.mxu1 }
 0x1dc   :  { %1451 = vmatmul.f32.gmra.mxu2 %v2769_v1  ;;  %1552 = vmatmul.f32.gmra.mxu3 %v2776_v9 }
 0x1df   :  { %v892_v34 = vpop.f32.mrf.mxu2  ;;  %v1069_v31 = vpop.f32.mrf.mxu3 }
 0x1e0   :  { %v893_v44 = vadd.f32 %v2795_v8, %v892_v34 }
 0x1e2   :  { %v2858_v62 = vadd.f32 %v1065_v7, %v893_v44  ;;  %v1311_v34 = vpop.f32.mrf.mxu1 }
 0x1e4   :  { %1455 = vmatmul.f32.gmra.mxu2 %v2776_v9  ;;  %1556 = vmatmul.f32.gmra.mxu3 %v2781_v14 }
 0x1e7   :  { %v900_v43 = vpop.f32.mrf.mxu2  ;;  %v1073_v19 = vpop.f32.mrf.mxu3 }
 0x1e8   :  { %v901_v17 = vadd.f32 %v2795_v8, %v900_v43 }
 0x1ea   :  { %v2863_v27 = vadd.f32 %v1069_v31, %v901_v17  ;;  %v1317_v43 = vpop.f32.mrf.mxu1 }
 0x1ec   :  { %1459 = vmatmul.f32.gmra.mxu2 %v2781_v14  ;;  %1560 = vmatmul.f32.gmra.mxu3 %v2785_v60 }
 0x1ef   :  { %v908_v1 = vpop.f32.mrf.mxu2  ;;  %v1077_v33 = vpop.f32.mrf.mxu3 }
 0x1f0   :  { %v909_v50 = vadd.f32 %v2795_v8, %v908_v1 }
 0x1f2   :  { %v1074_v11 = vadd.f32 %v1073_v19, %v909_v50 }
 0x1f4   :  { %1463 = vmatmul.f32.gmra.mxu2 %v2785_v60 }
 0x1f7   :  { %v916_v9 = vpop.f32.mrf.mxu2  ;;  %v1501_v6 = vpop.f32.mrf.mxu3 }
 0x1f8   :  { %v917_v20 = vadd.f32 %v2795_v8, %v916_v9 }
 0x1fa   :  { %v2870_v45 = vadd.f32 %v1077_v33, %v917_v20 }
 0x1ff   :  { %v1404_v13 = vpop.f32.mrf.mxu2  ;;  %v1505_v35 = vpop.f32.mrf.mxu3 }
 0x200   :  { %v1405_v22 = vadd.f32 %v1404_v13, %v2800_v61 }
 0x202   :  { %v2873_v14 = vadd.f32 %v1501_v6, %v1405_v22 }
 0x207   :  { %v1408_v10 = vpop.f32.mrf.mxu2  ;;  %v1509_v2 = vpop.f32.mrf.mxu3 }
 0x208   :  { %v1409_v40 = vadd.f32 %v1408_v10, %v2805_v42 }
 0x20a   :  { %v2876_v3 = vadd.f32 %v1505_v35, %v1409_v40 }
 0x20f   :  { %v1412_v59 = vpop.f32.mrf.mxu2  ;;  %v1513_v60 = vpop.f32.mrf.mxu3 }
 0x210   :  { %v1413_v54 = vadd.f32 %v1412_v59, %v2810_v28 }
 0x212   :  { %v2879_v36 = vadd.f32 %v1509_v2, %v1413_v54 }
 0x217   :  { %v1416_v8 = vpop.f32.mrf.mxu2  ;;  %v1517_v55 = vpop.f32.mrf.mxu3 }
 0x218   :  { %v1417_v57 = vadd.f32 %v1416_v8, %v2815_v32 }
 0x21a   :  { %v2882_v48 = vadd.f32 %v1513_v60, %v1417_v57 }
 0x21f   :  { %v1420_v61 = vpop.f32.mrf.mxu2  ;;  %v1521_v56 = vpop.f32.mrf.mxu3 }
 0x220   :  { %v1421_v15 = vadd.f32 %v1420_v61, %v2820_v41  ;;  %v1181_v41 = vpop.f32.mrf.mxu0 }
 0x222   :  { %v2885_v53 = vadd.f32 %v1517_v55, %v1421_v15 }
 0x227   :  { %v1424_v42 = vpop.f32.mrf.mxu2  ;;  %v1525_v47 = vpop.f32.mrf.mxu3 }
 0x228   :  { %v1425_v38 = vadd.f32 %v1424_v42, %v2825_v39  ;;  %v1186_v7 = vpop.f32.mrf.mxu0 }
 0x229   :  { %v1187_v57 = vadd.f32 %v1186_v7, %v2853_v0 }
 0x22a   :  { %v2888_v24 = vadd.f32 %v1521_v56, %v1425_v38 }
 0x22b   :  { %v1312_v38 = vadd.f32 %v1311_v34, %v1187_v57 }
 0x22f   :  { %v1428_v28 = vpop.f32.mrf.mxu2  ;;  %v1529_v21 = vpop.f32.mrf.mxu3 }
 0x230   :  { %v1429_v16 = vadd.f32 %v1428_v28, %v2830_v49  ;;  %v1191_v44 = vpop.f32.mrf.mxu0 }
 0x231   :  { %v1192_v2 = vadd.f32 %v1191_v44, %v2858_v62 }
 0x232   :  { %v2891_v4 = vadd.f32 %v1525_v47, %v1429_v16  ;;  %v1182_v47 = vadd.f32 %v1181_v41, %v2848_v30 }
 0x233   :  { %v1318_v61 = vadd.f32 %v1317_v43, %v1192_v2 }
 0x237   :  { %v1432_v32 = vpop.f32.mrf.mxu2  ;;  %v1533_v18 = vpop.f32.mrf.mxu3 }
 0x238   :  { %v1433_v52 = vadd.f32 %v1432_v32, %v2835_v58  ;;  %v1196_v1 = vpop.f32.mrf.mxu0 }
 0x23a   :  { %v2894_v26 = vadd.f32 %v1529_v21, %v1433_v52 }
 0x23f   :  { %v1436_v46 = vpop.f32.mrf.mxu2  ;;  %v1537_v25 = vpop.f32.mrf.mxu3 }
 0x240   :  { %v1437_v29 = vadd.f32 %v1436_v46, %v2840_v12  ;;  %v1323_v12 = vpop.f32.mrf.mxu1  ;;  %v1201_v9 = vpop.f32.mrf.mxu0  ;;  %v1306_v46 = vadd.f32 %v1305_v51, %v1182_v47 }
 0x241   :  { %v1202_v20 = vadd.f32 %v1201_v9, %v1074_v11 }
 0x242   :  { %v2897_v39 = vadd.f32 %v1533_v18, %v1437_v29 }
 0x247   :  { %v1440_v23 = vpop.f32.mrf.mxu2  ;;  %v1541_v63 = vpop.f32.mrf.mxu3 }
 0x248   :  { %v1441_v49 = vadd.f32 %v1440_v23, %v2845_v5  ;;  %v1329_v13 = vpop.f32.mrf.mxu1  ;;  %v1197_v5 = vadd.f32 %v1196_v1, %v2863_v27  ;;  %v1206_v60 = vpop.f32.mrf.mxu0 }
 0x249   :  { %v1330_v35 = vadd.f32 %v1329_v13, %v1202_v20  ;;  %v1207_v55 = vadd.f32 %v1206_v60, %v2870_v45 }
 0x24a   :  { %v2900_v37 = vadd.f32 %v1537_v25, %v1441_v49  ;;  %v1324_v40 = vadd.f32 %v1323_v12, %v1197_v5 }
 0x24c   :  { %v1573_v9 = vmax.f32 %v2900_v37, 0.0  ;;  %v1572_v37 = vmax.f32 %v2897_v39, 0.0  ;;  %v1571_v39 = vmax.f32 %v2894_v26, 0.0  ;;  %v1570_v26 = vmax.f32 %v2891_v4, 0.0 }
 0x24d   :  { %v1569_v4 = vmax.f32 %v2888_v24, 0.0  ;;  %v1568_v24 = vmax.f32 %v2885_v53, 0.0  ;;  %v1567_v53 = vmax.f32 %v2882_v48, 0.0  ;;  %v1566_v48 = vmax.f32 %v2879_v36, 0.0 }
 0x24e   :  { %v2972_v60 = vand.u32 4294901760, %v1572_v37  ;;  %v1565_v36 = vmax.f32 %v2876_v3, 0.0  ;;  %v1564_v3 = vmax.f32 %v2873_v14, 0.0 }
 0x24f   :  { %v1444_v31 = vpop.f32.mrf.mxu2  ;;  %v1545_v58 = vpop.f32.mrf.mxu3 }
 0x250   :  { %v1335_v56 = vpop.f32.mrf.mxu1  ;;  %v1445_v25 = vadd.f32 %v1444_v31, %v1306_v46  ;;  %v3024_v46 = vand.u32 4294901760, %v1568_v24  ;;  %v3075_v14 = vand.u32 4294901760, %v1564_v3 }
 0x251   :  { %v1336_v27 = vadd.f32 %v1335_v56, %v1207_v55 }
 0x252   :  { %v1542_v34 = vadd.f32 %v1541_v63, %v1445_v25 }
 0x257   :  { %v1448_v19 = vpop.f32.mrf.mxu2  ;;  %v1549_v17 = vpop.f32.mrf.mxu3 }
 0x258   :  { %v1449_v21 = vadd.f32 %v1448_v19, %v1312_v38  ;;  %v1574_v19 = vmax.f32 %v1542_v34, 0.0  ;;  %v3037_v34 = vand.u32 4294901760, %v1567_v53 }
 0x25a   :  { %v1546_v29 = vadd.f32 %v1545_v58, %v1449_v21  ;;  %v3011_v21 = vand.u32 4294901760, %v1569_v4 }
 0x25c   :  { %v1575_v51 = vmax.f32 %v1546_v29, 0.0  ;;  %v3032_v29 = vsub.f32 %v1569_v4, %v3011_v21 }
 0x25f   :  { %v1452_v33 = vpop.f32.mrf.mxu2  ;;  %v1553_v50 = vpop.f32.mrf.mxu3 }
 0x260   :  { %v1453_v11 = vadd.f32 %v1452_v33, %v1318_v61  ;;  %v2985_v61 = vand.u32 4294901760, %v1571_v39 }
 0x262   :  { %v1550_v32 = vadd.f32 %v1549_v17, %v1453_v11  ;;  %v2934_v17 = vand.u32 4294901760, %v1575_v51 }
 0x264   :  { %v1576_v23 = vmax.f32 %v1550_v32, 0.0  ;;  %v2954_v5 = vsub.f32 %v1575_v51, %v2934_v17 }
 0x266   :  { %v2921_v44 = vand.u32 4294901760, %v1576_v23 }
 0x267   :  { %v1456_v6 = vpop.f32.mrf.mxu2  ;;  %v1557_v22 = vpop.f32.mrf.mxu3 }
 0x268   :  { %v1457_v54 = vadd.f32 %v1456_v6, %v1324_v40  ;;  %v2941_v12 = vsub.f32 %v1576_v23, %v2921_v44  ;;  %v2946_v6 = vand.u32 4294901760, %v1574_v19 }
 0x26a   :  { %v1554_v15 = vadd.f32 %v1553_v50, %v1457_v54  ;;  %v2967_v40 = vsub.f32 %v1574_v19, %v2946_v6  ;;  %v3045_v19 = vsub.f32 %v1568_v24, %v3024_v46  ;;  %v1719_v24 = vsub.f32 %v1564_v3, %v3075_v14 }
 0x26c   :  { %v1577_v18 = vmax.f32 %v1554_v15, 0.0  ;;  %v1660_v57 = vand.u32 4294901760, %v2967_v40  ;;  %v2993_v15 = vsub.f32 %v1572_v37, %v2972_v60  ;;  %v1696_v37 = vand.u32 4294901760, %v3045_v19 }
 0x26e   :  { %v2909_v49 = vand.u32 4294901760, %v1577_v18  ;;  %v1661_v11 = vsub.f32 %v2967_v40, %v1660_v57 }
 0x26f   :  { %v1460_v10 = vpop.f32.mrf.mxu2  ;;  %v1561_v16 = vpop.f32.mrf.mxu3 }
 0x270   :  { %v1461_v59 = vadd.f32 %v1460_v10, %v1330_v35  ;;  %v2926_v58 = vsub.f32 %v1577_v18, %v2909_v49  ;;  %v1648_v35 = vand.u32 4294901760, %v2941_v12  ;;  %v1662_v47 = vand.u32 4294901760, %v1661_v11 }
 0x272   :  { %v1558_v8 = vadd.f32 %v1557_v22, %v1461_v59  ;;  %v1642_v50 = vand.u32 4294901760, %v2926_v58  ;;  %v2959_v22 = vand.u32 4294901760, %v1573_v9  ;;  %v1649_v2 = vsub.f32 %v2941_v12, %v1648_v35 }
 0x273   :  { %v1654_v59 = vand.u32 4294901760, %v2954_v5 }
 0x274   :  { %v1578_v42 = vmax.f32 %v1558_v8, 0.0  ;;  %v1643_v13 = vsub.f32 %v2926_v58, %v1642_v50  ;;  %v1650_v54 = vand.u32 4294901760, %v1649_v2  ;;  %v2980_v55 = vsub.f32 %v1573_v9, %v2959_v22 }
 0x275   :  { %v1655_v8 = vsub.f32 %v2954_v5, %v1654_v59 }
 0x276   :  { %v2907_v52 = vand.u32 4294901760, %v1578_v42  ;;  %v1644_v10 = vand.u32 4294901760, %v1643_v13  ;;  %v3058_v13 = vsub.f32 %v1567_v53, %v3037_v34 }
 0x277   :  { %v1464_v28 = vpop.f32.mrf.mxu2  ;;  %v1656_v56 = vand.u32 4294901760, %v1655_v8 }
 0x278   :  { %v1465_v62 = vadd.f32 %v1464_v28, %v1336_v27  ;;  %v2914_v30 = vsub.f32 %v1578_v42, %v2907_v52  ;;  %v1666_v42 = vand.u32 4294901760, %v2980_v55  ;;  %v2998_v27 = vand.u32 4294901760, %v1570_v26 }
 0x279   :  { %v3006_v28 = vsub.f32 %v1571_v39, %v2985_v61  ;;  %v1697_v39 = vsub.f32 %v3045_v19, %v1696_v37  ;;  %v1702_v8 = vand.u32 4294901760, %v3058_v13 }
 0x27a   :  { %v1562_v45 = vadd.f32 %v1561_v16, %v1465_v62  ;;  %v1636_v43 = vand.u32 4294901760, %v2914_v30  ;;  %v1667_v38 = vsub.f32 %v2980_v55, %v1666_v42  ;;  %v1672_v62 = vand.u32 4294901760, %v2993_v15 }
 0x27b   :  { %v3019_v18 = vsub.f32 %v1570_v26, %v2998_v27  ;;  %v1698_v26 = vand.u32 4294901760, %v1697_v39 }
 0x27c   :  { %v1579_v0 = vmax.f32 %v1562_v45, 0.0  ;;  %v1637_v33 = vsub.f32 %v2914_v30, %v1636_v43  ;;  %v1668_v16 = vand.u32 4294901760, %v1667_v38  ;;  %v1673_v32 = vsub.f32 %v2993_v15, %v1672_v62 }
 0x27d   :  { %v1678_v45 = vand.u32 4294901760, %v3006_v28  ;;  %v1684_v23 = vand.u32 4294901760, %v3019_v18 }
 0x27e   :  { %v2911_v7 = vand.u32 4294901760, %v1579_v0  ;;  %v1638_v20 = vand.u32 4294901760, %v1637_v33  ;;  %v3050_v33 = vand.u32 4294901760, %v1566_v48 }
 0x27f   :  { %v1679_v25 = vsub.f32 %v3006_v28, %v1678_v45 }
 0x280   :  { %v2917_v41 = vsub.f32 %v1579_v0, %v2911_v7  ;;  %1588 = vmatpush.xpose.msrb.mxu0 %v2911_v7  ;;  %1784 = vmatpush.xpose.msra.mxu3 %v2911_v7  ;;  %v1674_v0 = vand.u32 4294901760, %v1673_v32 }
 0x281   :  { %v1680_v51 = vand.u32 4294901760, %v1679_v25 }
 0x282   :  { %v1630_v31 = vand.u32 4294901760, %v2917_v41  ;;  %1731 = vmatpush.xpose.msra.mxu2 %v2917_v41 }
 0x284   :  { %1590 = vmatpush.xpose.msrb.mxu0 %v2907_v52  ;;  %1786 = vmatpush.xpose.msra.mxu3 %v2907_v52  ;;  %v1631_v63 = vsub.f32 %v2917_v41, %v1630_v31 }
 0x286   :  { %1734 = vmatpush.xpose.msra.mxu2 %v2914_v30  ;;  %v1632_v1 = vand.u32 4294901760, %v1631_v63  ;;  %v1685_v63 = vsub.f32 %v3019_v18, %v1684_v23  ;;  %v1580_v30 = vld [vmem:[%s3152_s3] sm:$0xff] }
 0x288   :  { %1592 = vmatpush.xpose.msrb.mxu0 %v2909_v49  ;;  %1633 = vmatpush.xpose.msrb.mxu1 %v1632_v1  ;;  %v1690_v1 = vand.u32 4294901760, %v3032_v29  ;;  %v1686_v9 = vand.u32 4294901760, %v1685_v63 }
 0x289   :  { %1788 = vmatpush.xpose.msra.mxu3 %v2909_v49 }
 0x28a   :  { %1737 = vmatpush.xpose.msra.mxu2 %v2926_v58  ;;  %v1581_v58 = vld [vmem:[%s3155_s6] sm:$0xff]  ;;  %s1981_s6 = smov [#allocation2]  }
 0x28b   :  { %s1934_s22 = sshll.u32 %s1981_s6, 4  ;;  %s1935_s22 = int_to_ptr.vmem [resolvable:$true] %s1934_s22 }
 0x28c   :  { %1594 = vmatpush.xpose.msrb.mxu0 %v2921_v44  ;;  %1639 = vmatpush.xpose.msrb.mxu1 %v1638_v20  ;;  %v1691_v20 = vsub.f32 %v3032_v29, %v1690_v1 }
 0x28d   :  { %1790 = vmatpush.xpose.msra.mxu3 %v2921_v44 }
 0x28e   :  { %1740 = vmatpush.xpose.msra.mxu2 %v2941_v12  ;;  %v1692_v2 = vand.u32 4294901760, %v1691_v20 }
 0x290   :  { %1596 = vmatpush.xpose.msrb.mxu0 %v2934_v17  ;;  %1645 = vmatpush.xpose.msrb.mxu1 %v1644_v10  ;;  %v3063_v10 = vand.u32 4294901760, %v1565_v36 }
 0x291   :  { %1792 = vmatpush.xpose.msra.mxu3 %v2934_v17 }
 0x292   :  { %1743 = vmatpush.xpose.msra.mxu2 %v2954_v5  ;;  %v3083_v11 = vsub.f32 %v1565_v36, %v3063_v10 }
 0x294   :  { %1598 = vmatpush.xpose.msrb.mxu0 %v2946_v6  ;;  %1651 = vmatpush.xpose.msrb.mxu1 %v1650_v54  ;;  %v3071_v54 = vsub.f32 %v1566_v48, %v3050_v33 }
 0x295   :  { %1794 = vmatpush.xpose.msra.mxu3 %v2946_v6 }
 0x296   :  { %1746 = vmatpush.xpose.msra.mxu2 %v2967_v40  ;;  %v1708_v4 = vand.u32 4294901760, %v3071_v54 }
 0x298   :  { %1600 = vmatpush.xpose.msrb.mxu0 %v2959_v22  ;;  %1657 = vmatpush.xpose.msrb.mxu1 %v1656_v56  ;;  %v1703_v56 = vsub.f32 %v3058_v13, %v1702_v8  ;;  %v1709_v38 = vsub.f32 %v3071_v54, %v1708_v4 }
 0x299   :  { %1796 = vmatpush.xpose.msra.mxu3 %v2959_v22 }
 0x29a   :  { %1749 = vmatpush.xpose.msra.mxu2 %v2980_v55  ;;  %v1710_v32 = vand.u32 4294901760, %v1709_v38 }
 0x29c   :  { %1602 = vmatpush.xpose.msrb.mxu0 %v2972_v60  ;;  %1663 = vmatpush.xpose.msrb.mxu1 %v1662_v47  ;;  %v1704_v47 = vand.u32 4294901760, %v1703_v56 }
 0x29d   :  { %1798 = vmatpush.xpose.msra.mxu3 %v2972_v60 }
 0x29e   :  { %1752 = vmatpush.xpose.msra.mxu2 %v2993_v15 }
 0x2a0   :  { %1604 = vmatpush.xpose.msrb.mxu0 %v2985_v61  ;;  %1669 = vmatpush.xpose.msrb.mxu1 %v1668_v16  ;;  %v1714_v16 = vand.u32 4294901760, %v3083_v11 }
 0x2a1   :  { %1800 = vmatpush.xpose.msra.mxu3 %v2985_v61 }
 0x2a2   :  { %1755 = vmatpush.xpose.msra.mxu2 %v3006_v28  ;;  %v1715_v53 = vsub.f32 %v3083_v11, %v1714_v16 }
 0x2a4   :  { %1606 = vmatpush.xpose.msrb.mxu0 %v2998_v27  ;;  %1675 = vmatpush.xpose.msrb.mxu1 %v1674_v0  ;;  %v1720_v0 = vand.u32 4294901760, %v1719_v24  ;;  %v1716_v25 = vand.u32 4294901760, %v1715_v53 }
 0x2a5   :  { %1802 = vmatpush.xpose.msra.mxu3 %v2998_v27 }
 0x2a6   :  { %1758 = vmatpush.xpose.msra.mxu2 %v3019_v18  ;;  %v1721_v48 = vsub.f32 %v1719_v24, %v1720_v0 }
 0x2a8   :  { %1608 = vmatpush.xpose.msrb.mxu0 %v3011_v21  ;;  %1681 = vmatpush.xpose.msrb.mxu1 %v1680_v51  ;;  %v1722_v51 = vand.u32 4294901760, %v1721_v48 }
 0x2a9   :  { %1804 = vmatpush.xpose.msra.mxu3 %v3011_v21 }
 0x2aa   :  { %1761 = vmatpush.xpose.msra.mxu2 %v3032_v29 }
 0x2ac   :  { %1610 = vmatpush.xpose.msrb.mxu0 %v3024_v46  ;;  %1687 = vmatpush.xpose.msrb.mxu1 %v1686_v9 }
 0x2ad   :  { %1806 = vmatpush.xpose.msra.mxu3 %v3024_v46 }
 0x2ae   :  { %1764 = vmatpush.xpose.msra.mxu2 %v3045_v19 }
 0x2b0   :  { %1612 = vmatpush.xpose.msrb.mxu0 %v3037_v34  ;;  %1693 = vmatpush.xpose.msrb.mxu1 %v1692_v2 }
 0x2b1   :  { %1808 = vmatpush.xpose.msra.mxu3 %v3037_v34 }
 0x2b2   :  { %1767 = vmatpush.xpose.msra.mxu2 %v3058_v13 }
 0x2b4   :  { %1614 = vmatpush.xpose.msrb.mxu0 %v3050_v33  ;;  %1699 = vmatpush.xpose.msrb.mxu1 %v1698_v26 }
 0x2b5   :  { %1810 = vmatpush.xpose.msra.mxu3 %v3050_v33 }
 0x2b6   :  { %1770 = vmatpush.xpose.msra.mxu2 %v3071_v54 }
 0x2b8   :  { %1616 = vmatpush.xpose.msrb.mxu0 %v3063_v10  ;;  %1705 = vmatpush.xpose.msrb.mxu1 %v1704_v47 }
 0x2b9   :  { %1812 = vmatpush.xpose.msra.mxu3 %v3063_v10 }
 0x2ba   :  { %1773 = vmatpush.xpose.msra.mxu2 %v3083_v11 }
 0x2bc   :  { %1618 = vmatpush.xpose.msrb.mxu0 %v3075_v14  ;;  %1711 = vmatpush.xpose.msrb.mxu1 %v1710_v32 }
 0x2bd   :  { %1814 = vmatpush.xpose.msra.mxu3 %v3075_v14 }
 0x2be   :  { %1776 = vmatpush.xpose.msra.mxu2 %v1719_v24 }
 0x2c0   :  { %1825 = vmatpush.xpose.msra.mxu0 %v1630_v31  ;;  %1717 = vmatpush.xpose.msrb.mxu1 %v1716_v25 }
 0x2c4   :  { %1829 = vmatpush.xpose.msra.mxu0 %v1636_v43  ;;  %1723 = vmatpush.xpose.msrb.mxu1 %v1722_v51 }
 0x2c8   :  { %1833 = vmatpush.xpose.msra.mxu0 %v1642_v50  ;;  %1892 = vmatpush.xpose.msra.mxu1 %v2911_v7  ;;  %v1619_v7 = vand.u32 4294901760, %v1580_v30 }
 0x2ca   :  { %v1620_v41 = vsub.f32 %v1580_v30, %v1619_v7  ;;  %1725 = vmatmul.f32.vlgmr.msrb.gmra.mxu1 %v1619_v7 }
 0x2cc   :  { %1837 = vmatpush.xpose.msra.mxu0 %v1648_v35  ;;  %1894 = vmatpush.xpose.msra.mxu1 %v2907_v52  ;;  %v1621_v52 = vand.u32 4294901760, %v1620_v41 }
 0x2cd   :  { %1779 = vmatmul.f32.vlgmr.msra.gmra.mxu2 %v1620_v41 }
 0x2ce   :  { %1818 = vmatmul.f32.vlgmr.msra.gmra.mxu3 %v1621_v52 }
 0x2d0   :  { %1841 = vmatpush.xpose.msra.mxu0 %v1654_v59  ;;  %1896 = vmatpush.xpose.msra.mxu1 %v2909_v49  ;;  %v1622_v49 = vsub.f32 %v1620_v41, %v1621_v52 }
 0x2d2   :  { %v1623_v31 = vand.u32 4294901760, %v1622_v49 }
 0x2d4   :  { %1845 = vmatpush.xpose.msra.mxu0 %v1660_v57  ;;  %1898 = vmatpush.xpose.msra.mxu1 %v2921_v44  ;;  %v1980_v44 = vmov 0  }
 0x2d5   :  { %1624 = vmatmul.f32.vlgmr.msrb.gmra.mxu0 %v1623_v31  ;;  %1951 = vset.pattern.permute.xlu0 %v1980_v44 }
 0x2d6   :  { %1584 = vperm.xlu0 %1951, %v1581_v58  }
 0x2d8   :  { %1849 = vmatpush.xpose.msra.mxu0 %v1666_v42  ;;  %1900 = vmatpush.xpose.msra.mxu1 %v2934_v17 }
 0x2dc   :  { %1853 = vmatpush.xpose.msra.mxu0 %v1672_v62  ;;  %1902 = vmatpush.xpose.msra.mxu1 %v2946_v6 }
 0x2e0   :  { %1857 = vmatpush.xpose.msra.mxu0 %v1678_v45  ;;  %1904 = vmatpush.xpose.msra.mxu1 %v2959_v22 }
 0x2e4   :  { %1861 = vmatpush.xpose.msra.mxu0 %v1684_v23  ;;  %1906 = vmatpush.xpose.msra.mxu1 %v2972_v60 }
 0x2e8   :  { %1865 = vmatpush.xpose.msra.mxu0 %v1690_v1  ;;  %1908 = vmatpush.xpose.msra.mxu1 %v2985_v61 }
 0x2ec   :  { %1869 = vmatpush.xpose.msra.mxu0 %v1696_v37  ;;  %1910 = vmatpush.xpose.msra.mxu1 %v2998_v27 }
 0x2f0   :  { %1873 = vmatpush.xpose.msra.mxu0 %v1702_v8  ;;  %1912 = vmatpush.xpose.msra.mxu1 %v3011_v21 }
 0x2f4   :  { %1877 = vmatpush.xpose.msra.mxu0 %v1708_v4  ;;  %1914 = vmatpush.xpose.msra.mxu1 %v3024_v46 }
 0x2f8   :  { %1881 = vmatpush.xpose.msra.mxu0 %v1714_v16  ;;  %1916 = vmatpush.xpose.msra.mxu1 %v3037_v34 }
 0x2fc   :  { %1885 = vmatpush.xpose.msra.mxu0 %v1720_v0  ;;  %1918 = vmatpush.xpose.msra.mxu1 %v3050_v33 }
 0x2ff   :  { %1887 = vmatmul.f32.vlgmr.msra.gmra.mxu0 %v1619_v7 }
 0x300   :  { %1920 = vmatpush.xpose.msra.mxu1 %v3063_v10 }
 0x304   :  { %1922 = vmatpush.xpose.msra.mxu1 %v3075_v14 }
 0x307   :  { %1924 = vmatmul.f32.vlgmr.msra.gmra.mxu1 %v1619_v7 }
 0x347   :  { %v1726_v50 = vpop.f32.mrf.mxu1 }
 0x348   :  { %v1585_v43 = vpop.permute.xlu0 %1584 }
 0x350   :  { %v1780_v5 = vpop.f32.mrf.mxu2 }
 0x351   :  { %v1819_v22 = vpop.f32.mrf.mxu3 }
 0x352   :  { %v1625_v17 = vpop.f32.mrf.mxu0 }
 0x353   :  { %v1626_v12 = vadd.f32 %v1625_v17, %v1585_v43 }
 0x355   :  { %v1727_v6 = vadd.f32 %v1726_v50, %v1626_v12 }
 0x357   :  { %v1781_v35 = vadd.f32 %v1780_v5, %v1727_v6 }
 0x359   :  { %v1820_v40 = vadd.f32 %v1819_v22, %v1781_v35 }
 0x37c   :  { %v1888_v59 = vpop.f32.mrf.mxu0 }
 0x37d   :  { %v1889_v60 = vadd.f32 %v1888_v59, %v1820_v40 }
 0x384   :  { %v1925_v55 = vpop.f32.mrf.mxu1 }
 0x385   :  { %v1926_v57 = vadd.f32 %v1925_v55, %v1889_v60 }
 0x387   :  { %1928 = vst [vmem:[#allocation2] sm:$0xff] %v1926_v57 }
 0x388   :  { %1939 = dma.vmem_to_hbm [thread:$0]  %s1935_s22, 128, %s1937_s25, [#allocation3]  }
 0x389   :  { %1978 = dma.done.wait [#allocation3], 128  }
 0x38a   :  { %1979 = vsyncadd [#allocation3], 4294967168 }
 0x38b   :  { %1944 = vsyncpa [#allocation3], 1 }

</bundles_post_ra>
